<compile_context>
chip_gen: v7x
topology: tpu7x:2x2x1
jax: 0.10.0
libtpu: 0.0.40
codegen_flags: <defaults>
</compile_context>

<pallas_src>
import functools

import jax
import jax.numpy as jnp
from jax.experimental import pallas as pl
from jax.experimental.pallas import tpu as pltpu

KH = KW = 3  # kernel size (module default)


def _conv_bn_relu_kernel(x_ref, w_ref, b_ref, o_ref, *, th, wo, cin):
    """One (batch, row-block) tile per grid step.

    x_ref: (H+2, W+2, Cin)        padded NHWC input image (resident), bf16
    w_ref: (KH*KW, Cin, Cout_p)   BN-scale-folded conv weights, bf16
    b_ref: (1, Cout_p)            folded BN bias, f32
    o_ref: (TH*W, Cout_p)         lane-dense output slab, bf16
    """
    r = pl.program_id(1)
    row0 = pl.multiple_of(r * th, th)
    cout_p = o_ref.shape[-1]

    # 9 accumulated per-tap MXU matmuls with f32 accumulation.  Each tap is a
    # (TH, W, Cin) window of the resident padded image; only one tap plus the
    # accumulator is live at a time (no im2col concat/relayout).
    acc = jnp.zeros((th * wo, cout_p), jnp.float32)
    for ky in range(KH):
        for kx in range(KW):
            tap = x_ref[pl.ds(row0 + ky, th), pl.ds(kx, wo), :]   # (TH, W, Cin)
            acc = acc + jnp.dot(tap.reshape(th * wo, cin),
                                w_ref[ky * KW + kx],
                                preferred_element_type=jnp.float32)

    # Fused BN bias + ReLU in f32 (scale already folded into the weights),
    # single cast to the bf16 output slab.
    y = jnp.maximum(acc + b_ref[...], 0.0)
    o_ref[...] = y.astype(o_ref.dtype)


def _round_up(x, m):
    return (x + m - 1) // m * m


def _vmem_limit_bytes():
    """Generation-aware VMEM limit: capacity minus ~25% headroom."""
    cap = 64 * 1024 * 1024  # conservative fallback (v7x per-TC VMEM)
    try:
        info = pltpu.get_tpu_info()
        c = getattr(info, "vmem_capacity_bytes", None)
        if c:
            cap = int(c)
    except Exception:
        pass
    return (cap * 3) // 4


def _pick_row_block(h, w, cin, cout_p, budget_bytes):
    """Largest row block TH that fits VMEM.

    Prefers TH == H (one tile per image).  Otherwise the largest divisor of H
    with (TH*W) % 16 == 0 (bf16 output sublane packing -> lowerable block)
    that fits the budget.
    """
    in_bytes = 2 * (h + 2) * (w + 2) * cin * 2          # resident image, x2 buffers, bf16
    wgt_bytes = 2 * (KH * KW * cin * cout_p * 2 + cout_p * 4)

    def fits(th):
        out_bytes = 2 * th * w * cout_p * 2              # bf16 output block, x2 buffers
        acc_bytes = th * w * cout_p * 4                  # f32 accumulator
        return in_bytes + wgt_bytes + out_bytes + acc_bytes <= budget_bytes

    if fits(h):
        return h
    for th in range(h - 1, 0, -1):
        if h % th == 0 and (th * w) % 16 == 0 and fits(th):
            return th
    # TODO(synk): manual halo DMA would bound VMEM here; fall back to full image.
    return h


@jax.jit
def conv_bn_relu(x_nchw, weight_oihw, gamma, beta, running_mean, running_var,
                 eps=1e-5):
    """Fused Conv(3x3,s1,p1,groups=1,no-bias) + BN(eval) + ReLU.  NCHW in/out."""
    N, Cin, H, W = x_nchw.shape
    Cout, Cin_w, kh, kw = weight_oihw.shape
    assert (kh, kw) == (KH, KW), "only 3x3 kernels supported"
    assert Cin_w == Cin, "only groups=1 supported"

    Cout_p = _round_up(Cout, 128)          # lane-dense output channels
    vmem_limit = _vmem_limit_bytes()
    TH = _pick_row_block(H, W, Cin, Cout_p, (vmem_limit * 9) // 10)
    R = H // TH

    # ---- glue (not the hot path): NCHW -> padded NHWC, cast to bf16 ----
    x_nhwc = jnp.transpose(x_nchw, (0, 2, 3, 1))
    x_pad = jnp.pad(x_nhwc, ((0, 0), (1, 1), (1, 1), (0, 0))).astype(jnp.bfloat16)

    # ---- fold BN: w <- w * scale ; bias = beta - mean * scale ----
    scale = (gamma / jnp.sqrt(running_var + eps)).astype(jnp.float32)
    bias = (beta - running_mean * scale).astype(jnp.float32)
    w = jnp.transpose(weight_oihw, (2, 3, 1, 0)).astype(jnp.float32)  # (KH,KW,Cin,Cout)
    w = w * scale[None, None, None, :]
    w = w.reshape(KH * KW, Cin, Cout)
    w = jnp.pad(w, ((0, 0), (0, 0), (0, Cout_p - Cout))).astype(jnp.bfloat16)
    bias2d = jnp.pad(bias, (0, Cout_p - Cout)).reshape(1, Cout_p)

    kernel = functools.partial(_conv_bn_relu_kernel, th=TH, wo=W, cin=Cin)

    out_flat = pl.pallas_call(
        kernel,
        out_shape=jax.ShapeDtypeStruct((N, H * W, Cout_p), jnp.bfloat16),
        grid_spec=pltpu.PrefetchScalarGridSpec(
            num_scalar_prefetch=0,
            grid=(N, R),
            in_specs=[
                pl.BlockSpec((None, H + 2, W + 2, Cin), lambda n, r: (n, 0, 0, 0)),
                pl.BlockSpec((KH * KW, Cin, Cout_p), lambda n, r: (0, 0, 0)),
                pl.BlockSpec((1, Cout_p), lambda n, r: (0, 0)),
            ],
            out_specs=pl.BlockSpec((None, TH * W, Cout_p), lambda n, r: (n, r, 0)),
        ),
        compiler_params=pltpu.CompilerParams(
            # batch axis "parallel" so v7x megacore splits on distinct images;
            # row-block axis "arbitrary" (near-zero codegen impact otherwise).
            dimension_semantics=("parallel", "arbitrary"),
            vmem_limit_bytes=vmem_limit,
        ),
    )(x_pad, w, bias2d)

    # Un-pad channels, restore NCHW f32 (cheap wrapper-side relayout; the f32
    # cast fuses into the same pass).
    out = out_flat[:, :, :Cout].reshape(N, H, W, Cout).astype(jnp.float32)
    return jnp.transpose(out, (0, 3, 1, 2))


def _reference_f32(x, w, gamma, beta, mean, var, eps=1e-5):
    """Pure f32 lax reference with the original module semantics."""
    conv = jax.lax.conv_general_dilated(
        x.astype(jnp.float32), w.astype(jnp.float32),
        window_strides=(1, 1), padding=((1, 1), (1, 1)),
        dimension_numbers=("NCHW", "OIHW", "NCHW"))
    scale = gamma / jnp.sqrt(var + eps)
    bias = beta - mean * scale
    return jnp.maximum(conv * scale[None, :, None, None]
                       + bias[None, :, None, None], 0.0)


def _reference_bf16_matched(x, w, gamma, beta, mean, var, eps=1e-5):
    """Same arithmetic as the kernel: bf16-rounded x and scale-folded bf16
    weights, f32 accumulation, then bias + ReLU (output rounding not applied)."""
    scale = gamma / jnp.sqrt(var + eps)
    bias = beta - mean * scale
    w_s = (w.astype(jnp.float32) * scale[:, None, None, None]).astype(jnp.bfloat16)
    conv = jax.lax.conv_general_dilated(
        x.astype(jnp.bfloat16).astype(jnp.float32),
        w_s.astype(jnp.float32),
        window_strides=(1, 1), padding=((1, 1), (1, 1)),
        dimension_numbers=("NCHW", "OIHW", "NCHW"))
    return jnp.maximum(conv + bias[None, :, None, None], 0.0)


if __name__ == "__main__":
    key = jax.random.PRNGKey(0)
    k_x, k_w, k_g, k_b, k_m, k_v = jax.random.split(key, 6)

    N, Cin, H, W = 2, 4, 16, 16
    Cout = 8

    x = jax.random.normal(k_x, (N, Cin, H, W), dtype=jnp.float32)
    weight = jax.random.normal(k_w, (Cout, Cin, KH, KW), dtype=jnp.float32) * 0.1
    gamma = 1.0 + 0.1 * jax.random.normal(k_g, (Cout,), dtype=jnp.float32)
    beta = 0.1 * jax.random.normal(k_b, (Cout,), dtype=jnp.float32)
    running_mean = 0.1 * jax.random.normal(k_m, (Cout,), dtype=jnp.float32)
    running_var = jnp.abs(jax.random.normal(k_v, (Cout,), dtype=jnp.float32)) + 0.5

    out = conv_bn_relu(x, weight, gamma, beta, running_mean, running_var)
    out = jax.block_until_ready(out)

    assert out.shape == (N, Cout, H, W), out.shape

    # Check against a reference matching the kernel arithmetic (bf16 operands,
    # folded scale, f32 accumulation); tolerance covers the bf16 output store.
    ref_m = _reference_bf16_matched(x, weight, gamma, beta,
                                    running_mean, running_var)
    assert jnp.allclose(out, ref_m, atol=2e-2, rtol=2e-2), float(
        jnp.max(jnp.abs(out - ref_m)))

    # Loose check against the full-f32 module semantics (bf16 rounding only).
    ref_f = _reference_f32(x, weight, gamma, beta, running_mean, running_var)
    assert jnp.allclose(out, ref_f, atol=6e-2, rtol=6e-2), float(
        jnp.max(jnp.abs(out - ref_f)))

    print("KERNEL_OK")
</pallas_src>

<mosaic_0001>
module attributes {stable_mosaic.version = 11 : i64} {
  func.func @_conv_bn_relu_kernel(%arg0: i32, %arg1: i32, %arg2: memref<1x18x18x4xbf16, #tpu.memory_space<vmem>>, %arg3: memref<9x4x128xbf16, #tpu.memory_space<vmem>>, %arg4: memref<1x128xf32, #tpu.memory_space<vmem>>, %arg5: memref<1x256x128xbf16, #tpu.memory_space<vmem>>) attributes {dimension_semantics = [#tpu.dimension_semantics<parallel>, #tpu.dimension_semantics<arbitrary>], iteration_bounds = array<i64: 2, 1>, scalar_prefetch = 0 : i64, scratch_operands = 0 : i64, tpu.core_type = #tpu.core_type<tc>, window_params = [{transform_indices = @transform_0, window_bounds = array<i64: 1, 18, 18, 4>}, {pipeline_mode = #tpu.pipeline_mode<synchronous>, transform_indices = @transform_1, window_bounds = array<i64: 9, 4, 128>}, {pipeline_mode = #tpu.pipeline_mode<synchronous>, transform_indices = @transform_2, window_bounds = array<i64: 1, 128>}, {transform_indices = @transform_3, window_bounds = array<i64: 1, 256, 128>}]} {
    %c16_i32 = arith.constant 16 : i32
    %0 = arith.muli %arg1, %c16_i32 : i32
    %1 = tpu.assume_multiple %0, 16 : i32
    %cst = arith.constant 0.000000e+00 : f32
    %2 = vector.broadcast %cst : f32 to vector<256x128xf32>
    %c0_i32 = arith.constant 0 : i32
    %3 = arith.addi %1, %c0_i32 : i32
    %c0 = arith.constant 0 : index
    %4 = arith.index_cast %3 : i32 to index
    %c0_0 = arith.constant 0 : index
    %c0_1 = arith.constant 0 : index
    %5 = vector.load %arg2[%c0, %4, %c0_0, %c0_1] : memref<1x18x18x4xbf16, #tpu.memory_space<vmem>>, vector<1x16x16x4xbf16>
    %6 = vector.shape_cast %5 : vector<1x16x16x4xbf16> to vector<16x16x4xbf16>
    %7 = vector.shape_cast %6 : vector<16x16x4xbf16> to vector<256x4xbf16>
    %c0_2 = arith.constant 0 : index
    %c0_3 = arith.constant 0 : index
    %c0_4 = arith.constant 0 : index
    %8 = vector.load %arg3[%c0_2, %c0_3, %c0_4] : memref<9x4x128xbf16, #tpu.memory_space<vmem>>, vector<1x4x128xbf16>
    %9 = vector.shape_cast %8 : vector<1x4x128xbf16> to vector<4x128xbf16>
    %cst_5 = arith.constant dense<0.000000e+00> : vector<256x128xf32>
    %10 = tpu.matmul %7, %9, %cst_5 {dimension_numbers = #tpu.dot_dimension_numbers<[1], [0], [0], [1], [0, 0, 1, 1], [], []>} : vector<256x4xbf16>, vector<4x128xbf16>, vector<256x128xf32> -> vector<256x128xf32>
    %11 = arith.addf %2, %10 : vector<256x128xf32>
    %c0_i32_6 = arith.constant 0 : i32
    %12 = arith.addi %1, %c0_i32_6 : i32
    %c0_7 = arith.constant 0 : index
    %13 = arith.index_cast %12 : i32 to index
    %c1 = arith.constant 1 : index
    %c0_8 = arith.constant 0 : index
    %14 = vector.load %arg2[%c0_7, %13, %c1, %c0_8] : memref<1x18x18x4xbf16, #tpu.memory_space<vmem>>, vector<1x16x16x4xbf16>
    %15 = vector.shape_cast %14 : vector<1x16x16x4xbf16> to vector<16x16x4xbf16>
    %16 = vector.shape_cast %15 : vector<16x16x4xbf16> to vector<256x4xbf16>
    %c1_9 = arith.constant 1 : index
    %c0_10 = arith.constant 0 : index
    %c0_11 = arith.constant 0 : index
    %17 = vector.load %arg3[%c1_9, %c0_10, %c0_11] : memref<9x4x128xbf16, #tpu.memory_space<vmem>>, vector<1x4x128xbf16>
    %18 = vector.shape_cast %17 : vector<1x4x128xbf16> to vector<4x128xbf16>
    %cst_12 = arith.constant dense<0.000000e+00> : vector<256x128xf32>
    %19 = tpu.matmul %16, %18, %cst_12 {dimension_numbers = #tpu.dot_dimension_numbers<[1], [0], [0], [1], [0, 0, 1, 1], [], []>} : vector<256x4xbf16>, vector<4x128xbf16>, vector<256x128xf32> -> vector<256x128xf32>
    %20 = arith.addf %11, %19 : vector<256x128xf32>
    %c0_i32_13 = arith.constant 0 : i32
    %21 = arith.addi %1, %c0_i32_13 : i32
    %c0_14 = arith.constant 0 : index
    %22 = arith.index_cast %21 : i32 to index
    %c2 = arith.constant 2 : index
    %c0_15 = arith.constant 0 : index
    %23 = vector.load %arg2[%c0_14, %22, %c2, %c0_15] : memref<1x18x18x4xbf16, #tpu.memory_space<vmem>>, vector<1x16x16x4xbf16>
    %24 = vector.shape_cast %23 : vector<1x16x16x4xbf16> to vector<16x16x4xbf16>
    %25 = vector.shape_cast %24 : vector<16x16x4xbf16> to vector<256x4xbf16>
    %c2_16 = arith.constant 2 : index
    %c0_17 = arith.constant 0 : index
    %c0_18 = arith.constant 0 : index
    %26 = vector.load %arg3[%c2_16, %c0_17, %c0_18] : memref<9x4x128xbf16, #tpu.memory_space<vmem>>, vector<1x4x128xbf16>
    %27 = vector.shape_cast %26 : vector<1x4x128xbf16> to vector<4x128xbf16>
    %cst_19 = arith.constant dense<0.000000e+00> : vector<256x128xf32>
    %28 = tpu.matmul %25, %27, %cst_19 {dimension_numbers = #tpu.dot_dimension_numbers<[1], [0], [0], [1], [0, 0, 1, 1], [], []>} : vector<256x4xbf16>, vector<4x128xbf16>, vector<256x128xf32> -> vector<256x128xf32>
    %29 = arith.addf %20, %28 : vector<256x128xf32>
    %c1_i32 = arith.constant 1 : i32
    %30 = arith.addi %1, %c1_i32 : i32
    %c0_20 = arith.constant 0 : index
    %31 = arith.index_cast %30 : i32 to index
    %c0_21 = arith.constant 0 : index
    %c0_22 = arith.constant 0 : index
    %32 = vector.load %arg2[%c0_20, %31, %c0_21, %c0_22] : memref<1x18x18x4xbf16, #tpu.memory_space<vmem>>, vector<1x16x16x4xbf16>
    %33 = vector.shape_cast %32 : vector<1x16x16x4xbf16> to vector<16x16x4xbf16>
    %34 = vector.shape_cast %33 : vector<16x16x4xbf16> to vector<256x4xbf16>
    %c3 = arith.constant 3 : index
    %c0_23 = arith.constant 0 : index
    %c0_24 = arith.constant 0 : index
    %35 = vector.load %arg3[%c3, %c0_23, %c0_24] : memref<9x4x128xbf16, #tpu.memory_space<vmem>>, vector<1x4x128xbf16>
    %36 = vector.shape_cast %35 : vector<1x4x128xbf16> to vector<4x128xbf16>
    %cst_25 = arith.constant dense<0.000000e+00> : vector<256x128xf32>
    %37 = tpu.matmul %34, %36, %cst_25 {dimension_numbers = #tpu.dot_dimension_numbers<[1], [0], [0], [1], [0, 0, 1, 1], [], []>} : vector<256x4xbf16>, vector<4x128xbf16>, vector<256x128xf32> -> vector<256x128xf32>
    %38 = arith.addf %29, %37 : vector<256x128xf32>
    %c1_i32_26 = arith.constant 1 : i32
    %39 = arith.addi %1, %c1_i32_26 : i32
    %c0_27 = arith.constant 0 : index
    %40 = arith.index_cast %39 : i32 to index
    %c1_28 = arith.constant 1 : index
    %c0_29 = arith.constant 0 : index
    %41 = vector.load %arg2[%c0_27, %40, %c1_28, %c0_29] : memref<1x18x18x4xbf16, #tpu.memory_space<vmem>>, vector<1x16x16x4xbf16>
    %42 = vector.shape_cast %41 : vector<1x16x16x4xbf16> to vector<16x16x4xbf16>
    %43 = vector.shape_cast %42 : vector<16x16x4xbf16> to vector<256x4xbf16>
    %c4 = arith.constant 4 : index
    %c0_30 = arith.constant 0 : index
    %c0_31 = arith.constant 0 : index
    %44 = vector.load %arg3[%c4, %c0_30, %c0_31] : memref<9x4x128xbf16, #tpu.memory_space<vmem>>, vector<1x4x128xbf16>
    %45 = vector.shape_cast %44 : vector<1x4x128xbf16> to vector<4x128xbf16>
    %cst_32 = arith.constant dense<0.000000e+00> : vector<256x128xf32>
    %46 = tpu.matmul %43, %45, %cst_32 {dimension_numbers = #tpu.dot_dimension_numbers<[1], [0], [0], [1], [0, 0, 1, 1], [], []>} : vector<256x4xbf16>, vector<4x128xbf16>, vector<256x128xf32> -> vector<256x128xf32>
    %47 = arith.addf %38, %46 : vector<256x128xf32>
    %c1_i32_33 = arith.constant 1 : i32
    %48 = arith.addi %1, %c1_i32_33 : i32
    %c0_34 = arith.constant 0 : index
    %49 = arith.index_cast %48 : i32 to index
    %c2_35 = arith.constant 2 : index
    %c0_36 = arith.constant 0 : index
    %50 = vector.load %arg2[%c0_34, %49, %c2_35, %c0_36] : memref<1x18x18x4xbf16, #tpu.memory_space<vmem>>, vector<1x16x16x4xbf16>
    %51 = vector.shape_cast %50 : vector<1x16x16x4xbf16> to vector<16x16x4xbf16>
    %52 = vector.shape_cast %51 : vector<16x16x4xbf16> to vector<256x4xbf16>
    %c5 = arith.constant 5 : index
    %c0_37 = arith.constant 0 : index
    %c0_38 = arith.constant 0 : index
    %53 = vector.load %arg3[%c5, %c0_37, %c0_38] : memref<9x4x128xbf16, #tpu.memory_space<vmem>>, vector<1x4x128xbf16>
    %54 = vector.shape_cast %53 : vector<1x4x128xbf16> to vector<4x128xbf16>
    %cst_39 = arith.constant dense<0.000000e+00> : vector<256x128xf32>
    %55 = tpu.matmul %52, %54, %cst_39 {dimension_numbers = #tpu.dot_dimension_numbers<[1], [0], [0], [1], [0, 0, 1, 1], [], []>} : vector<256x4xbf16>, vector<4x128xbf16>, vector<256x128xf32> -> vector<256x128xf32>
    %56 = arith.addf %47, %55 : vector<256x128xf32>
    %c2_i32 = arith.constant 2 : i32
    %57 = arith.addi %1, %c2_i32 : i32
    %c0_40 = arith.constant 0 : index
    %58 = arith.index_cast %57 : i32 to index
    %c0_41 = arith.constant 0 : index
    %c0_42 = arith.constant 0 : index
    %59 = vector.load %arg2[%c0_40, %58, %c0_41, %c0_42] : memref<1x18x18x4xbf16, #tpu.memory_space<vmem>>, vector<1x16x16x4xbf16>
    %60 = vector.shape_cast %59 : vector<1x16x16x4xbf16> to vector<16x16x4xbf16>
    %61 = vector.shape_cast %60 : vector<16x16x4xbf16> to vector<256x4xbf16>
    %c6 = arith.constant 6 : index
    %c0_43 = arith.constant 0 : index
    %c0_44 = arith.constant 0 : index
    %62 = vector.load %arg3[%c6, %c0_43, %c0_44] : memref<9x4x128xbf16, #tpu.memory_space<vmem>>, vector<1x4x128xbf16>
    %63 = vector.shape_cast %62 : vector<1x4x128xbf16> to vector<4x128xbf16>
    %cst_45 = arith.constant dense<0.000000e+00> : vector<256x128xf32>
    %64 = tpu.matmul %61, %63, %cst_45 {dimension_numbers = #tpu.dot_dimension_numbers<[1], [0], [0], [1], [0, 0, 1, 1], [], []>} : vector<256x4xbf16>, vector<4x128xbf16>, vector<256x128xf32> -> vector<256x128xf32>
    %65 = arith.addf %56, %64 : vector<256x128xf32>
    %c2_i32_46 = arith.constant 2 : i32
    %66 = arith.addi %1, %c2_i32_46 : i32
    %c0_47 = arith.constant 0 : index
    %67 = arith.index_cast %66 : i32 to index
    %c1_48 = arith.constant 1 : index
    %c0_49 = arith.constant 0 : index
    %68 = vector.load %arg2[%c0_47, %67, %c1_48, %c0_49] : memref<1x18x18x4xbf16, #tpu.memory_space<vmem>>, vector<1x16x16x4xbf16>
    %69 = vector.shape_cast %68 : vector<1x16x16x4xbf16> to vector<16x16x4xbf16>
    %70 = vector.shape_cast %69 : vector<16x16x4xbf16> to vector<256x4xbf16>
    %c7 = arith.constant 7 : index
    %c0_50 = arith.constant 0 : index
    %c0_51 = arith.constant 0 : index
    %71 = vector.load %arg3[%c7, %c0_50, %c0_51] : memref<9x4x128xbf16, #tpu.memory_space<vmem>>, vector<1x4x128xbf16>
    %72 = vector.shape_cast %71 : vector<1x4x128xbf16> to vector<4x128xbf16>
    %cst_52 = arith.constant dense<0.000000e+00> : vector<256x128xf32>
    %73 = tpu.matmul %70, %72, %cst_52 {dimension_numbers = #tpu.dot_dimension_numbers<[1], [0], [0], [1], [0, 0, 1, 1], [], []>} : vector<256x4xbf16>, vector<4x128xbf16>, vector<256x128xf32> -> vector<256x128xf32>
    %74 = arith.addf %65, %73 : vector<256x128xf32>
    %c2_i32_53 = arith.constant 2 : i32
    %75 = arith.addi %1, %c2_i32_53 : i32
    %c0_54 = arith.constant 0 : index
    %76 = arith.index_cast %75 : i32 to index
    %c2_55 = arith.constant 2 : index
    %c0_56 = arith.constant 0 : index
    %77 = vector.load %arg2[%c0_54, %76, %c2_55, %c0_56] : memref<1x18x18x4xbf16, #tpu.memory_space<vmem>>, vector<1x16x16x4xbf16>
    %78 = vector.shape_cast %77 : vector<1x16x16x4xbf16> to vector<16x16x4xbf16>
    %79 = vector.shape_cast %78 : vector<16x16x4xbf16> to vector<256x4xbf16>
    %c8 = arith.constant 8 : index
    %c0_57 = arith.constant 0 : index
    %c0_58 = arith.constant 0 : index
    %80 = vector.load %arg3[%c8, %c0_57, %c0_58] : memref<9x4x128xbf16, #tpu.memory_space<vmem>>, vector<1x4x128xbf16>
    %81 = vector.shape_cast %80 : vector<1x4x128xbf16> to vector<4x128xbf16>
    %cst_59 = arith.constant dense<0.000000e+00> : vector<256x128xf32>
    %82 = tpu.matmul %79, %81, %cst_59 {dimension_numbers = #tpu.dot_dimension_numbers<[1], [0], [0], [1], [0, 0, 1, 1], [], []>} : vector<256x4xbf16>, vector<4x128xbf16>, vector<256x128xf32> -> vector<256x128xf32>
    %83 = arith.addf %74, %82 : vector<256x128xf32>
    %c0_60 = arith.constant 0 : index
    %c0_61 = arith.constant 0 : index
    %84 = vector.load %arg4[%c0_60, %c0_61] : memref<1x128xf32, #tpu.memory_space<vmem>>, vector<1x128xf32>
    %85 = vector.broadcast %84 : vector<1x128xf32> to vector<256x128xf32>
    %86 = arith.addf %83, %85 : vector<256x128xf32>
    %cst_62 = arith.constant 0.000000e+00 : f32
    %87 = vector.broadcast %cst_62 : f32 to vector<256x128xf32>
    %88 = arith.maximumf %86, %87 : vector<256x128xf32>
    %89 = arith.truncf %88 : vector<256x128xf32> to vector<256x128xbf16>
    %c0_63 = arith.constant 0 : index
    %c0_64 = arith.constant 0 : index
    %c0_65 = arith.constant 0 : index
    %90 = vector.load %arg5[%c0_63, %c0_64, %c0_65] : memref<1x256x128xbf16, #tpu.memory_space<vmem>>, vector<1x256x128xbf16>
    %91 = vector.shape_cast %90 : vector<1x256x128xbf16> to vector<256x128xbf16>
    %92 = vector.shape_cast %89 : vector<256x128xbf16> to vector<1x256x128xbf16>
    tpu.vector_store %arg5[%c0_63, %c0_64, %c0_65], %92 {strides = array<i32>} : memref<1x256x128xbf16, #tpu.memory_space<vmem>>, vector<1x256x128xbf16>,
    return
  }
  func.func @transform_0(%arg0: i32, %arg1: i32) -> (i32, i32, i32, i32) {
    %c0_i32 = arith.constant 0 : i32
    %c0_i32_0 = arith.constant 0 : i32
    %c0_i32_1 = arith.constant 0 : i32
    %c0_i32_2 = arith.constant 0 : i32
    return %arg0, %c0_i32, %c0_i32_0, %c0_i32_1 : i32, i32, i32, i32
  }
  func.func @transform_1(%arg0: i32, %arg1: i32) -> (i32, i32, i32) {
    %c0_i32 = arith.constant 0 : i32
    %c0_i32_0 = arith.constant 0 : i32
    %c0_i32_1 = arith.constant 0 : i32
    %c0_i32_2 = arith.constant 0 : i32
    return %c0_i32, %c0_i32_0, %c0_i32_1 : i32, i32, i32
  }
  func.func @transform_2(%arg0: i32, %arg1: i32) -> (i32, i32) {
    %c0_i32 = arith.constant 0 : i32
    %c0_i32_0 = arith.constant 0 : i32
    %c0_i32_1 = arith.constant 0 : i32
    return %c0_i32, %c0_i32_0 : i32, i32
  }
  func.func @transform_3(%arg0: i32, %arg1: i32) -> (i32, i32, i32) {
    %c0_i32 = arith.constant 0 : i32
    %c0_i32_0 = arith.constant 0 : i32
    return %arg0, %arg1, %c0_i32 : i32, i32, i32
  }
}

</mosaic_0001>

<bundles_post_ra>
// kernel: conv_bn_relu.1
= control target key start
LH: loop header
LB: loop body
LE: loop exit
PB: predicated region body
PF: predicated region fallthrough
CT: control target
= control target key end

     0   :  { %s6694_s12 = smov 0   ;;  %s6696_s13 = smov 0   ;;  %s8495_s0 = inlined_call_operand.vmem [shape: bf16[2,18,18,4], index: 0, kind: input, shape index: {}]   ;;  %s8496_s1 = inlined_call_operand.vmem [shape: bf16[9,4,128], index: 1, kind: input, shape index: {}]   ;;  %s8497_s2 = inlined_call_operand.vmem [shape: f32[1,128], index: 2, kind: input, shape index: {}]   ;;  %s8498_s3 = inlined_call_operand.vmem [shape: bf16[2,256,128], index: 3, kind: output, shape index: {}]  }
   0x1   :  { %s6698_s14 = smov 0  }
   0x2 LB: > { %s25_s15 = sadd.s32 1, %s6668_s13  ;;  %p5090_p0 = scmp.ge.s32.totalorder %s6672_s14, 1  ;;  %s6672_s14 = sphi %s6698_s14, %s13_s14   ;;  %s6668_s13 = sphi %s6696_s13, %s8567_s13   ;;  %s6664_s12 = sphi %s6694_s12, %s8566_s12  }
   0x3   : > { %p27_p1 = scmp.ge.s32.totalorder %s25_s15, 2  ;;  %p151_p2 = scmp.lt.s32.totalorder %s6672_s14, 3 }
   0x5   : > { %s8569_s15 = smov (%p27_p1, %s25_s15), 0  ;;  %p152_p3 = pnand %p5090_p0, %p151_p2 }
   0x7   : > { %155 = sbr.rel (%p152_p3) target bundleno = 590 (0x24e), region = 32 }
   0xe   : > { %v5094_v0 = vld [vmem:[%s8496_s1 + $0x2] sm:$0x3]  ;;  %vm734_vm0 = vcmask 1041408   ;;  %v5321_v1 = vld [vmem:[%s8496_s1 + $0x8] sm:$0x3]  ;;  %p179_p4 = scmp.lt.s32.totalorder %s6664_s12, 1 }
   0xf   : > { %6510 = vmatprep.subr.msk.bf16.mxu1 %vm734_vm0, %v5094_v0  ;;  %6514 = vmatprep.subr.msk.bf16.mxu0 %vm734_vm0, %v5321_v1  ;;  %v736_v2 = vsel %vm734_vm0, %v5094_v0, 0  ;;  %v6722_v3 = vsel %vm734_vm0, %v5321_v1, 0  ;;  %v231_v4 = vld [vmem:[%s8496_s1] sm:$0x3]  ;;  %v5386_v5 = vld [vmem:[%s8496_s1 + $0xa] sm:$0x3] }
  0x10   : > { %8512 = vst [vmem:[#allocation2_spill] sm:$0xff] %v6722_v3  ;;  %5947 = vmatpush3.bf16.msra.mxu1 %v736_v2  ;;  %6083 = vmatpush3.bf16.msra.mxu0 %v6722_v3  ;;  %s8571_s12 = smov (!%p179_p4, %s6664_s12), 1  ;;  %vm248_vm1 = vsmask.f32 3328  ;;  %vm249_vm2 = vsmask.f32 7440 }
  0x11   : > { %6511 = vmatprep.subr.msk.bf16.mxu1 %vm734_vm0, %v231_v4  ;;  %6516 = vmatprep.subr.msk.bf16.mxu0 %vm734_vm0, %v5386_v5  ;;  %s6520_s24 = smul.u32 216, %s8571_s12  ;;  %vm685_vm3 = vcmask 31744   ;;  %v6752_v17 = vsel %vm734_vm0, %v231_v4, 0  ;;  %v6758_v26 = vld [vmem:[%s8496_s1 + $0xc] sm:$0x3]  ;;  %vm6765_vm4 = vmor %vm248_vm1, %vm249_vm2  ;;  %v6771_v37 = vsel %vm734_vm0, %v5386_v5, 0 }
  0x12   : > { %v6775_v41 = vsel %vm734_vm0, %v6758_v26, 0  ;;  %vm1239_vm5 = vcmask 1042432   ;;  %vm1240_vm6 = vcmask 1046532   ;;  %s5665_s21 = sshll.u32 %s8571_s12, 7 }
  0x13   : > { %s6739_s27 = scalar_lea.vmem %s8495_s0, %s6520_s24  ;;  %vm6991_vm7 = vmor %vm1239_vm5, %vm1240_vm6  ;;  %s8436_s24 = scalar_lea.vmem %s8498_s3, %s5665_s21 }
  0x14   : > { %v199_v6 = vld [vmem:[%s6739_s27] sm:$0xf]  ;;  %v200_v7 = vld [vmem:[%s6739_s27 + $0x4] sm:$0xf]  ;;  %v232_v8 = vld [vmem:[%s6739_s27 + $0x8] sm:$0x1] }
  0x15   : > { %v252_v9 = vshrl.u32 %v199_v6, 16  ;;  %v255_v10 = vshll.u32 %v199_v6, 16  ;;  %v261_v11 = vshll.u32 %v200_v7, 16  ;;  %v265_v12 = vshrl.u32 %v200_v7, 16  ;;  %v5273_v13 = vld [vmem:[%s6739_s27 + $0xc] sm:$0xf] }
  0x16   : > { %v271_v14 = vshll.u32 %v232_v8, 16  ;;  %v6746_v15 = vld [vmem:[%s6739_s27 + $0x10] sm:$0xf]  ;;  %v6749_v16 = vld [vmem:[%s6739_s27 + $0x14] sm:$0x1]  ;;  %v2059_v23 = vshrl.u32 %v5273_v13, 16 }
  0x17   : > { %v254_v18 = vrot.slane %v252_v9, 4  ;;  %v257_v19 = vrot.slane %v255_v10, 5  ;;  %v263_v20 = vrot.slane %v261_v11, 5  ;;  %v267_v21 = vrot.slane %v265_v12, 4  ;;  %v201_v31 = vld [vmem:[%s6739_s27 + $0xc] sm:$0xf] }
  0x18   : > { %v273_v22 = vrot.slane %v271_v14, 5  ;;  %v2062_v24 = vshll.u32 %v5273_v13, 16  ;;  %v2068_v25 = vshll.u32 %v6746_v15, 16  ;;  %v2072_v29 = vshrl.u32 %v6746_v15, 16  ;;  %v202_v36 = vld [vmem:[%s6739_s27 + $0x10] sm:$0xf] }
  0x19   : > { %v258_v27 = vor.u32 %v257_v19, %v254_v18  ;;  %v268_v28 = vor.u32 %v267_v21, %v263_v20  ;;  %v2078_v30 = vshll.u32 %v6749_v16, 16  ;;  %v2061_v33 = vrot.slane %v2059_v23, 4  ;;  %v233_v44 = vld [vmem:[%s6739_s27 + $0x14] sm:$0x1]  ;;  %v5276_v55 = vld [vmem:[%s6739_s27 + $0x18] sm:$0xf] }
  0x1a   : > { %v2064_v34 = vrot.slane %v2062_v24, 5  ;;  %v2070_v35 = vrot.slane %v2068_v25, 5  ;;  %v2074_v40 = vrot.slane %v2072_v29, 4  ;;  %v276_v45 = vshrl.u32 %v201_v31, 16  ;;  %v6784_v60 = vld [vmem:[%s6739_s27 + $0x1c] sm:$0xf] }
  0x1b   : > { %v259_v38 = vrot.slane %v258_v27, 4  ;;  %v269_v39 = vrot.slane %v268_v28, 4  ;;  %v2080_v43 = vrot.slane %v2078_v30, 5  ;;  %v279_v46 = vshll.u32 %v201_v31, 16  ;;  %v6792_v1 = vld [vmem:[%s6739_s27 + $0x20] sm:$0x1] }
  0x1c   : > { %v2065_v42 = vor.u32 %v2064_v34, %v2061_v33  ;;  %v2075_v49 = vor.u32 %v2074_v40, %v2070_v35  ;;  %v285_v50 = vshll.u32 %v202_v36, 16  ;;  %v278_v53 = vrot.slane %v276_v45, 4  ;;  %v203_v18 = vld [vmem:[%s6739_s27 + $0x18] sm:$0xf]  ;;  %v204_v23 = vld [vmem:[%s6739_s27 + $0x1c] sm:$0xf] }
  0x1d   : > { %v264_v47 = vsel %vm6765_vm4, %v259_v38, %v263_v20  ;;  %v274_v48 = vsel %vm6765_vm4, %v269_v39, %v273_v22  ;;  %v281_v54 = vrot.slane %v279_v46, 5  ;;  %v289_v58 = vshrl.u32 %v202_v36, 16  ;;  %v234_v31 = vld [vmem:[%s6739_s27 + $0x20] sm:$0x1]  ;;  %v5279_v40 = vld [vmem:[%s6739_s27 + $0x24] sm:$0xf] }
  0x1e   : > { %v5095_v51 = vcombine.low %v264_v47, %v274_v48  ;;  %v2066_v52 = vrot.slane %v2065_v42, 4  ;;  %v2076_v56 = vrot.slane %v2075_v49, 4  ;;  %v287_v57 = vrot.slane %v285_v50, 5  ;;  %v6815_v46 = vld [vmem:[%s6739_s27 + $0x28] sm:$0xf] }
  0x1f   : > { %v295_v59 = vshll.u32 %v233_v44, 16  ;;  %v2802_v62 = vrot.slane %v6746_v15, 5  ;;  %v2805_v63 = vrot.slane %v6749_v16, 5  ;;  %v282_v0 = vor.u32 %v281_v54, %v278_v53  ;;  %v6824_v54 = vld [vmem:[%s6739_s27 + $0x2c] sm:$0x1] }
  0x20   : > { %5948 = vmatprep.mubr.msk.bf16.mxu1 %vm685_vm3, %v5095_v51  ;;  %v2071_v61 = vsel %vm6765_vm4, %v2066_v52, %v2070_v35  ;;  %v2081_v2 = vsel %vm6765_vm4, %v2076_v56, %v2080_v43  ;;  %v291_v4 = vrot.slane %v289_v58, 4  ;;  %v2083_v6 = vshrl.u32 %v5276_v55, 16  ;;  %v5175_v51 = vld [vmem:[%s8496_s1 + $0x4] sm:$0x3]  ;;  %v7024_v16 = vld [vmem:[%s6739_s27 + $0x7c] sm:$0xf] }
  0x21   : > { %v297_v5 = vrot.slane %v295_v59, 5  ;;  %v5322_v7 = vcombine.low %v2071_v61, %v2081_v2  ;;  %v283_v8 = vrot.slane %v282_v0, 4  ;;  %v2086_v9 = vshll.u32 %v5276_v55, 16  ;;  %v205_v0 = vld [vmem:[%s6739_s27 + $0x24] sm:$0xf] }
  0x22   : > { %v2092_v10 = vshll.u32 %v6784_v60, 16  ;;  %v292_v11 = vor.u32 %v291_v4, %v287_v57  ;;  %v2085_v12 = vrot.slane %v2083_v6, 4  ;;  %v2096_v13 = vshrl.u32 %v6784_v60, 16 }
  0x23   : > { %v2102_v14 = vshll.u32 %v6792_v1, 16  ;;  %6084 = vmatprep.mubr.msk.bf16.mxu0 %vm685_vm3, %v5322_v7  ;;  %v288_v19 = vsel %vm6765_vm4, %v283_v8, %v287_v57  ;;  %v2088_v20 = vrot.slane %v2086_v9, 5  ;;  %v2809_v22 = vrot.slane %v6784_v60, 5  ;;  %v206_v7 = vld [vmem:[%s6739_s27 + $0x28] sm:$0xf] }
  0x24   : > { %v2094_v21 = vrot.slane %v2092_v10, 5  ;;  %v293_v24 = vrot.slane %v292_v11, 4  ;;  %v2098_v25 = vrot.slane %v2096_v13, 4  ;;  %v2812_v28 = vrot.slane %v6792_v1, 5  ;;  %v235_v13 = vld [vmem:[%s6739_s27 + $0x2c] sm:$0x1] }
  0x25   : > { %v2104_v27 = vrot.slane %v2102_v14, 5  ;;  %v2089_v29 = vor.u32 %v2088_v20, %v2085_v12  ;;  %v6808_v30 = vrot.slane %v2809_v22, 4  ;;  %v300_v33 = vshrl.u32 %v203_v18, 16 }
  0x26   : > { %v303_v34 = vshll.u32 %v203_v18, 16  ;;  %v298_v35 = vsel %vm6765_vm4, %v293_v24, %v297_v5  ;;  %v2099_v36 = vor.u32 %v2098_v25, %v2094_v21  ;;  %v309_v38 = vshll.u32 %v204_v23, 16  ;;  %v5282_v24 = vld [vmem:[%s6739_s27 + $0x30] sm:$0xf] }
  0x27   : > { %v313_v39 = vshrl.u32 %v204_v23, 16  ;;  %v5096_v42 = vcombine.low %v288_v19, %v298_v35  ;;  %v2090_v43 = vrot.slane %v2089_v29, 4  ;;  %v302_v44 = vrot.slane %v300_v33, 4  ;;  %v6844_v33 = vld [vmem:[%s6739_s27 + $0x34] sm:$0xf] }
  0x28   : > { %v305_v45 = vrot.slane %v303_v34, 5  ;;  %v2100_v47 = vrot.slane %v2099_v36, 4  ;;  %v311_v48 = vrot.slane %v309_v38, 5  ;;  %v319_v50 = vshll.u32 %v234_v31, 16 }
  0x29   : > { %v315_v49 = vrot.slane %v313_v39, 4  ;;  %5949 = vmatmul.mubr.msk.bf16.vlgmr.msra.gmra.mrb[0].mxu1 %vm685_vm3, %v5096_v42  ;;  %v2095_v52 = vsel %vm6765_vm4, %v2090_v43, %v2094_v21  ;;  %v2107_v55 = vshrl.u32 %v5279_v40, 16  ;;  %v2110_v56 = vshll.u32 %v5279_v40, 16  ;;  %v6852_v40 = vld [vmem:[%s6739_s27 + $0x38] sm:$0x1] }
  0x2a   : > { %v306_v53 = vor.u32 %v305_v45, %v302_v44  ;;  %5981 = vmatpush3.bf16.msra.mxu1 %v6752_v17  ;;  %v2105_v57 = vsel %vm6765_vm4, %v2100_v47, %v2104_v27  ;;  %v321_v59 = vrot.slane %v319_v50, 5  ;;  %v2116_v61 = vshll.u32 %v6815_v46, 16 }
  0x2b   : > { %v316_v58 = vor.u32 %v315_v49, %v311_v48  ;;  %v5323_v2 = vcombine.low %v2095_v52, %v2105_v57  ;;  %v2109_v5 = vrot.slane %v2107_v55, 4  ;;  %v2112_v6 = vrot.slane %v2110_v56, 5  ;;  %6512 = vmatprep.subr.msk.bf16.mxu1 %vm734_vm0, %v5175_v51  ;;  %v207_v52 = vld [vmem:[%s6739_s27 + $0x30] sm:$0xf] }
  0x2c   : > { %v307_v4 = vrot.slane %v306_v53, 4  ;;  %v2118_v9 = vrot.slane %v2116_v61, 5  ;;  %v2120_v17 = vshrl.u32 %v6815_v46, 16  ;;  %v2126_v10 = vshll.u32 %v6824_v54, 16 }
  0x2d   : > { %v317_v8 = vrot.slane %v316_v58, 4  ;;  %6085 = vmatmul.mubr.msk.bf16.vlgmr.msra.gmra.mrb[0].mxu0 %vm685_vm3, %v5323_v2  ;;  %v2113_v12 = vor.u32 %v2112_v6, %v2109_v5  ;;  %v324_v14 = vshrl.u32 %v205_v0, 16  ;;  %v327_v18 = vshll.u32 %v205_v0, 16  ;;  %v208_v58 = vld [vmem:[%s6739_s27 + $0x34] sm:$0xf] }
  0x2e   : > { %v312_v11 = vsel %vm6765_vm4, %v307_v4, %v311_v48  ;;  %6117 = vmatpush3.bf16.msra.mxu0 %v6771_v37  ;;  %v2122_v20 = vrot.slane %v2120_v17, 4  ;;  %v2128_v21 = vrot.slane %v2126_v10, 5  ;;  %v333_v23 = vshll.u32 %v206_v7, 16  ;;  %v236_v4 = vld [vmem:[%s6739_s27 + $0x38] sm:$0x1] }
  0x2f   : > { %v322_v19 = vsel %vm6765_vm4, %v317_v8, %v321_v59  ;;  %v2114_v27 = vrot.slane %v2113_v12, 4  ;;  %v326_v29 = vrot.slane %v324_v14, 4  ;;  %v329_v31 = vrot.slane %v327_v18, 5  ;;  %6517 = vmatprep.subr.msk.bf16.mxu0 %vm734_vm0, %v6758_v26  ;;  %v5285_v12 = vld [vmem:[%s6739_s27 + $0x3c] sm:$0xf] }
  0x30   : > { %v5097_v25 = vcombine.low %v312_v11, %v322_v19  ;;  %v2123_v34 = vor.u32 %v2122_v20, %v2118_v9  ;;  %v335_v35 = vrot.slane %v333_v23, 5  ;;  %v337_v37 = vshrl.u32 %v206_v7, 16  ;;  %v6869_v20 = vld [vmem:[%s6739_s27 + $0x40] sm:$0xf] }
  0x31   : > { %v343_v36 = vshll.u32 %v235_v13, 16  ;;  %v2119_v38 = vsel %vm6765_vm4, %v2114_v27, %v2118_v9  ;;  %v330_v39 = vor.u32 %v329_v31, %v326_v29  ;;  %v2131_v42 = vshrl.u32 %v5282_v24, 16 }
  0x32   : > { %5952 = vmatprep.mubr.msk.bf16.mxu1 %vm685_vm3, %v5097_v25  ;;  %v2134_v43 = vshll.u32 %v5282_v24, 16  ;;  %v2124_v44 = vrot.slane %v2123_v34, 4  ;;  %v339_v45 = vrot.slane %v337_v37, 4  ;;  %v2140_v26 = vshll.u32 %v6844_v33, 16  ;;  %v6874_v34 = vld [vmem:[%s6739_s27 + $0x44] sm:$0x1] }
  0x33   : > { %v345_v47 = vrot.slane %v343_v36, 5  ;;  %v331_v48 = vrot.slane %v330_v39, 4  ;;  %v2133_v49 = vrot.slane %v2131_v42, 4  ;;  %v2144_v51 = vshrl.u32 %v6844_v33, 16  ;;  %v209_v42 = vld [vmem:[%s6739_s27 + $0x3c] sm:$0xf] }
  0x34   : > { %v2136_v50 = vrot.slane %v2134_v43, 5  ;;  %v2129_v53 = vsel %vm6765_vm4, %v2124_v44, %v2128_v21  ;;  %v340_v55 = vor.u32 %v339_v45, %v335_v35  ;;  %v2142_v56 = vrot.slane %v2140_v26, 5  ;;  %v210_v26 = vld [vmem:[%s6739_s27 + $0x40] sm:$0xf] }
  0x35   : > { %v2150_v57 = vshll.u32 %v6852_v40, 16  ;;  %v5324_v59 = vcombine.low %v2119_v38, %v2129_v53  ;;  %v336_v61 = vsel %vm6765_vm4, %v331_v48, %v335_v35  ;;  %v2146_v2 = vrot.slane %v2144_v51, 4 }
  0x36   : > { %v2137_v0 = vor.u32 %v2136_v50, %v2133_v49  ;;  %v341_v5 = vrot.slane %v340_v55, 4  ;;  %v348_v7 = vshrl.u32 %v207_v52, 16  ;;  %v351_v8 = vshll.u32 %v207_v52, 16 }
  0x37   : > { %v2152_v6 = vrot.slane %v2150_v57, 5  ;;  %6088 = vmatprep.mubr.msk.bf16.mxu0 %vm685_vm3, %v5324_v59  ;;  %v2147_v17 = vor.u32 %v2146_v2, %v2142_v56  ;;  %v357_v10 = vshll.u32 %v208_v58, 16  ;;  %v361_v11 = vshrl.u32 %v208_v58, 16  ;;  %v5288_v2 = vld [vmem:[%s6739_s27 + $0x48] sm:$0xf] }
  0x38   : > { %v2138_v9 = vrot.slane %v2137_v0, 4  ;;  %v346_v13 = vsel %vm6765_vm4, %v341_v5, %v345_v47  ;;  %v350_v14 = vrot.slane %v348_v7, 4  ;;  %v353_v18 = vrot.slane %v351_v8, 5  ;;  %v6892_v8 = vld [vmem:[%s6739_s27 + $0x4c] sm:$0xf] }
  0x39   : > { %v367_v19 = vshll.u32 %v236_v4, 16  ;;  %v5098_v21 = vcombine.low %v336_v61, %v346_v13  ;;  %v2148_v24 = vrot.slane %v2147_v17, 4  ;;  %v359_v25 = vrot.slane %v357_v10, 5  ;;  %v237_v61 = vld [vmem:[%s6739_s27 + $0x44] sm:$0x1] }
  0x3a   : > { %v2143_v23 = vsel %vm6765_vm4, %v2138_v9, %v2142_v56  ;;  %v354_v27 = vor.u32 %v353_v18, %v350_v14  ;;  %v363_v29 = vrot.slane %v361_v11, 4  ;;  %v2155_v35 = vshrl.u32 %v5285_v12, 16 }
  0x3b   : > { %v369_v31 = vrot.slane %v367_v19, 5  ;;  %5953 = vmatmul.mubr.msk.bf16.gmra.mrb[4].mxu1 %vm685_vm3, %v5098_v21  ;;  %v2153_v37 = vsel %vm6765_vm4, %v2148_v24, %v2152_v6  ;;  %v2158_v36 = vshll.u32 %v5285_v12, 16  ;;  %v2164_v38 = vshll.u32 %v6869_v20, 16 }
  0x3c   : > { %v2168_v39 = vshrl.u32 %v6869_v20, 16  ;;  %v5325_v43 = vcombine.low %v2143_v23, %v2153_v37  ;;  %v355_v44 = vrot.slane %v354_v27, 4  ;;  %v364_v45 = vor.u32 %v363_v29, %v359_v25  ;;  %v6900_v23 = vld [vmem:[%s6739_s27 + $0x50] sm:$0x1]  ;;  %v6904_v27 = vld [vmem:[%s6739_s27 + $0x48] sm:$0xf] }
  0x3d   : > { %v2157_v47 = vrot.slane %v2155_v35, 4  ;;  %v2160_v48 = vrot.slane %v2158_v36, 5  ;;  %v2166_v49 = vrot.slane %v2164_v38, 5  ;;  %v2174_v51 = vshll.u32 %v6874_v34, 16  ;;  %v6907_v36 = vld [vmem:[%s6739_s27 + $0x4c] sm:$0xf] }
  0x3e   : > { %v2170_v50 = vrot.slane %v2168_v39, 4  ;;  %6089 = vmatmul.mubr.msk.bf16.gmra.mrb[4].mxu0 %vm685_vm3, %v5325_v43  ;;  %v360_v52 = vsel %vm6765_vm4, %v355_v44, %v359_v25  ;;  %v365_v53 = vrot.slane %v364_v45, 4  ;;  %v372_v55 = vshrl.u32 %v209_v42, 16 }
  0x3f   : > { %v375_v56 = vshll.u32 %v209_v42, 16  ;;  %v2161_v57 = vor.u32 %v2160_v48, %v2157_v47  ;;  %v2176_v59 = vrot.slane %v2174_v51, 5  ;;  %v381_v0 = vshll.u32 %v210_v26, 16 }
  0x40   : > { %v2171_v58 = vor.u32 %v2170_v50, %v2166_v49  ;;  %v370_v4 = vsel %vm6765_vm4, %v365_v53, %v369_v31  ;;  %v374_v5 = vrot.slane %v372_v55, 4  ;;  %v385_v7 = vshrl.u32 %v210_v26, 16  ;;  %v238_v26 = vld [vmem:[%s6739_s27 + $0x50] sm:$0x1]  ;;  %v5291_v53 = vld [vmem:[%s6739_s27 + $0x54] sm:$0xf] }
  0x41   : > { %v377_v6 = vrot.slane %v375_v56, 5  ;;  %v5099_v9 = vcombine.low %v360_v52, %v370_v4  ;;  %v2162_v17 = vrot.slane %v2161_v57, 4  ;;  %v383_v11 = vrot.slane %v381_v0, 5  ;;  %v6923_v4 = vld [vmem:[%s6739_s27 + $0x58] sm:$0xf] }
  0x42   : > { %v2172_v10 = vrot.slane %v2171_v58, 4  ;;  %v387_v13 = vrot.slane %v385_v7, 4  ;;  %v391_v14 = vshll.u32 %v237_v61, 16  ;;  %v2179_v18 = vshrl.u32 %v5288_v2, 16 }
  0x43   : > { %v378_v12 = vor.u32 %v377_v6, %v374_v5  ;;  %5956 = vmatprep.mubr.msk.bf16.mxu1 %vm685_vm3, %v5099_v9  ;;  %v2167_v19 = vsel %vm6765_vm4, %v2162_v17, %v2166_v49  ;;  %v2182_v24 = vshll.u32 %v5288_v2, 16  ;;  %v2188_v25 = vshll.u32 %v6892_v8, 16 }
  0x44   : > { %v2177_v21 = vsel %vm6765_vm4, %v2172_v10, %v2176_v59  ;;  %v388_v35 = vor.u32 %v387_v13, %v383_v11  ;;  %v393_v37 = vrot.slane %v391_v14, 5  ;;  %v2181_v38 = vrot.slane %v2179_v18, 4 }
  0x45   : > { %v5326_v29 = vcombine.low %v2167_v19, %v2177_v21  ;;  %v379_v31 = vrot.slane %v378_v12, 4  ;;  %v2184_v39 = vrot.slane %v2182_v24, 5  ;;  %v2190_v42 = vrot.slane %v2188_v25, 5  ;;  %v6929_v12 = vld [vmem:[%s6739_s27 + $0x5c] sm:$0x1] }
  0x46   : > { %v2192_v43 = vshrl.u32 %v6892_v8, 16  ;;  %v389_v45 = vrot.slane %v388_v35, 4  ;;  %v2198_v47 = vshll.u32 %v6900_v23, 16  ;;  %v396_v48 = vshrl.u32 %v6904_v27, 16  ;;  %v6933_v24 = vld [vmem:[%s6739_s27 + $0x54] sm:$0xf] }
  0x47   : > { %6092 = vmatprep.mubr.msk.bf16.mxu0 %vm685_vm3, %v5326_v29  ;;  %v384_v44 = vsel %vm6765_vm4, %v379_v31, %v383_v11  ;;  %v2185_v49 = vor.u32 %v2184_v39, %v2181_v38  ;;  %v399_v51 = vshll.u32 %v6904_v27, 16  ;;  %v405_v52 = vshll.u32 %v6907_v36, 16 }
  0x48   : > { %v2194_v50 = vrot.slane %v2192_v43, 4  ;;  %v394_v55 = vsel %vm6765_vm4, %v389_v45, %v393_v37  ;;  %v2200_v56 = vrot.slane %v2198_v47, 5  ;;  %v398_v57 = vrot.slane %v396_v48, 4  ;;  %v6939_v37 = vld [vmem:[%s6739_s27 + $0x58] sm:$0xf] }
  0x49   : > { %v409_v58 = vshrl.u32 %v6907_v36, 16  ;;  %v5100_v59 = vcombine.low %v384_v44, %v394_v55  ;;  %v2186_v61 = vrot.slane %v2185_v49, 4  ;;  %v401_v2 = vrot.slane %v399_v51, 5 }
  0x4a   : > { %v2195_v0 = vor.u32 %v2194_v50, %v2190_v42  ;;  %v407_v5 = vrot.slane %v405_v52, 5  ;;  %v415_v7 = vshll.u32 %v238_v26, 16  ;;  %v2203_v9 = vshrl.u32 %v5291_v53, 16  ;;  %v239_v26 = vld [vmem:[%s6739_s27 + $0x5c] sm:$0x1] }
  0x4b   : > { %v411_v6 = vrot.slane %v409_v58, 4  ;;  %5957 = vmatmul.mubr.msk.bf16.gmra.mrb[8].mxu1 %vm685_vm3, %v5100_v59  ;;  %v2191_v17 = vsel %vm6765_vm4, %v2186_v61, %v2190_v42  ;;  %v402_v11 = vor.u32 %v401_v2, %v398_v57  ;;  %v2206_v13 = vshll.u32 %v5291_v53, 16  ;;  %v5294_v53 = vld [vmem:[%s6739_s27 + $0x60] sm:$0xf]  ;;  %v6953_v59 = vld [vmem:[%s6739_s27 + $0x64] sm:$0xf] }
  0x4c   : > { %v2196_v10 = vrot.slane %v2195_v0, 4  ;;  %v417_v18 = vrot.slane %v415_v7, 5  ;;  %v2205_v19 = vrot.slane %v2203_v9, 4  ;;  %v2212_v21 = vshll.u32 %v6923_v4, 16  ;;  %v6960_v9 = vld [vmem:[%s6739_s27 + $0x68] sm:$0x1] }
  0x4d   : > { %v412_v14 = vor.u32 %v411_v6, %v407_v5  ;;  %v403_v29 = vrot.slane %v402_v11, 4  ;;  %v2208_v31 = vrot.slane %v2206_v13, 5  ;;  %v2216_v35 = vshrl.u32 %v6923_v4, 16 }
  0x4e   : > { %v2201_v25 = vsel %vm6765_vm4, %v2196_v10, %v2200_v56  ;;  %v2214_v42 = vrot.slane %v2212_v21, 5  ;;  %v2222_v43 = vshll.u32 %v6929_v12, 16  ;;  %v420_v48 = vshrl.u32 %v6933_v24, 16 }
  0x4f   : > { %v5327_v38 = vcombine.low %v2191_v17, %v2201_v25  ;;  %v413_v39 = vrot.slane %v412_v14, 4  ;;  %v408_v44 = vsel %vm6765_vm4, %v403_v29, %v407_v5  ;;  %v2209_v45 = vor.u32 %v2208_v31, %v2205_v19  ;;  %v6964_v19 = vld [vmem:[%s6739_s27 + $0x60] sm:$0xf] }
  0x50   : > { %v2218_v47 = vrot.slane %v2216_v35, 4  ;;  %v2224_v50 = vrot.slane %v2222_v43, 5  ;;  %v423_v51 = vshll.u32 %v6933_v24, 16  ;;  %v429_v52 = vshll.u32 %v6939_v37, 16  ;;  %v6970_v35 = vld [vmem:[%s6739_s27 + $0x64] sm:$0xf] }
  0x51   : > { %6093 = vmatmul.mubr.msk.bf16.gmra.mrb[8].mxu0 %vm685_vm3, %v5327_v38  ;;  %v418_v49 = vsel %vm6765_vm4, %v413_v39, %v417_v18  ;;  %v2210_v56 = vrot.slane %v2209_v45, 4  ;;  %v422_v58 = vrot.slane %v420_v48, 4  ;;  %v433_v2 = vshrl.u32 %v6939_v37, 16 }
  0x52   : > { %v5101_v55 = vcombine.low %v408_v44, %v418_v49  ;;  %v2219_v57 = vor.u32 %v2218_v47, %v2214_v42  ;;  %v425_v61 = vrot.slane %v423_v51, 5  ;;  %v431_v0 = vrot.slane %v429_v52, 5 }
  0x53   : > { %v439_v5 = vshll.u32 %v239_v26, 16  ;;  %v2215_v6 = vsel %vm6765_vm4, %v2210_v56, %v2214_v42  ;;  %v2227_v17 = vshrl.u32 %v5294_v53, 16  ;;  %v2230_v10 = vshll.u32 %v5294_v53, 16 }
  0x54   : > { %5960 = vmatprep.mubr.msk.bf16.mxu1 %vm685_vm3, %v5101_v55  ;;  %v2220_v7 = vrot.slane %v2219_v57, 4  ;;  %v426_v11 = vor.u32 %v425_v61, %v422_v58  ;;  %v435_v13 = vrot.slane %v433_v2, 4  ;;  %v2236_v18 = vshll.u32 %v6953_v59, 16  ;;  %v5354_v58 = vld [vmem:[%s6739_s27 + $0xc] sm:$0xe] }
  0x55   : > { %v441_v14 = vrot.slane %v439_v5, 5  ;;  %v2229_v25 = vrot.slane %v2227_v17, 4  ;;  %v2232_v29 = vrot.slane %v2230_v10, 5  ;;  %v2240_v31 = vshrl.u32 %v6953_v59, 16 }
  0x56   : > { %v2225_v21 = vsel %vm6765_vm4, %v2220_v7, %v2224_v50  ;;  %v427_v39 = vrot.slane %v426_v11, 4  ;;  %v436_v42 = vor.u32 %v435_v13, %v431_v0  ;;  %v2238_v43 = vrot.slane %v2236_v18, 5  ;;  %v240_v50 = vld [vmem:[%s6739_s27 + $0x68] sm:$0x1] }
  0x57   : > { %v5328_v38 = vcombine.low %v2215_v6, %v2225_v21  ;;  %v2233_v44 = vor.u32 %v2232_v29, %v2229_v25  ;;  %v2242_v45 = vrot.slane %v2240_v31, 4  ;;  %v2246_v47 = vshll.u32 %v6960_v9, 16  ;;  %v6998_v29 = vld [vmem:[%s6739_s27 + $0x70] sm:$0xf] }
  0x58   : > { %v444_v26 = vshrl.u32 %v6964_v19, 16  ;;  %v432_v48 = vsel %vm6765_vm4, %v427_v39, %v431_v0  ;;  %v437_v49 = vrot.slane %v436_v42, 4  ;;  %v447_v51 = vshll.u32 %v6964_v19, 16  ;;  %v6985_v0 = vld [vmem:[%s6739_s27 + $0x6c] sm:$0xf] }
  0x59   : > { %6096 = vmatprep.mubr.msk.bf16.mxu0 %vm685_vm3, %v5328_v38  ;;  %v453_v52 = vshll.u32 %v6970_v35, 16  ;;  %v2234_v53 = vrot.slane %v2233_v44, 4  ;;  %v2243_v55 = vor.u32 %v2242_v45, %v2238_v43  ;;  %v2248_v56 = vrot.slane %v2246_v47, 5 }
  0x5a   : > { %v446_v57 = vrot.slane %v444_v26, 4  ;;  %v442_v61 = vsel %vm6765_vm4, %v437_v49, %v441_v14  ;;  %v449_v2 = vrot.slane %v447_v51, 5  ;;  %v457_v6 = vshrl.u32 %v6970_v35, 16  ;;  %v241_v26 = vld [vmem:[%s6739_s27 + $0x74] sm:$0x1] }
  0x5b   : > { %v455_v5 = vrot.slane %v453_v52, 5  ;;  %v5102_v7 = vcombine.low %v432_v48, %v442_v61  ;;  %v2239_v17 = vsel %vm6765_vm4, %v2234_v53, %v2238_v43  ;;  %v2244_v10 = vrot.slane %v2243_v55, 4  ;;  %v5355_v48 = vld [vmem:[%s6739_s27 + $0x18] sm:$0xe] }
  0x5c   : > { %v463_v11 = vshll.u32 %v240_v50, 16  ;;  %v450_v14 = vor.u32 %v449_v2, %v446_v57  ;;  %v459_v18 = vrot.slane %v457_v6, 4  ;;  %v5370_v21 = vrot.slane %v5354_v58, 9  ;;  %v7017_v53 = vld [vmem:[%s6739_s27 + $0x78] sm:$0xf] }
  0x5d   : > { %v2804_v25 = vrot.slane %v2802_v62, 4  ;;  %5961 = vmatmul.mubr.msk.bf16.gmra.mrb[12].mxu1 %vm685_vm3, %v5102_v7  ;;  %v2249_v31 = vsel %vm6765_vm4, %v2244_v10, %v2248_v56  ;;  %v468_v39 = vshrl.u32 %v6985_v0, 16  ;;  %v471_v42 = vshll.u32 %v6985_v0, 16  ;;  %v242_v57 = vld [vmem:[%s6739_s27 + $0x80] sm:$0x1] }
  0x5e   : > { %v465_v38 = vrot.slane %v463_v11, 5  ;;  %v5329_v43 = vcombine.low %v2239_v17, %v2249_v31  ;;  %v451_v44 = vrot.slane %v450_v14, 4  ;;  %v460_v45 = vor.u32 %v459_v18, %v455_v5  ;;  %v5356_v10 = vld [vmem:[%s6739_s27 + $0x24] sm:$0xe] }
  0x5f   : > { %v2803_v47 = vsel %vm6991_vm7, %v5370_v21, %v2802_v62  ;;  %v2806_v49 = vsel %vm6991_vm7, %v2804_v25, %v2805_v63  ;;  %v470_v50 = vrot.slane %v468_v39, 4  ;;  %v473_v51 = vrot.slane %v471_v42, 5  ;;  %v7043_v39 = vld [vmem:[%s6739_s27 + $0x84] sm:$0xf] }
  0x60   : > { %v477_v52 = vshll.u32 %v6998_v29, 16  ;;  %6097 = vmatmul.mubr.msk.bf16.gmra.mrb[12].mxu0 %vm685_vm3, %v5329_v43  ;;  %v456_v15 = vsel %vm6765_vm4, %v451_v44, %v455_v5  ;;  %v461_v62 = vrot.slane %v460_v45, 4  ;;  %v5387_v55 = vcombine.low %v2803_v47, %v2806_v49  ;;  %v7051_v43 = vld [vmem:[%s6739_s27 + $0x88] sm:$0xf] }
  0x61   : > { %v481_v56 = vshrl.u32 %v6998_v29, 16  ;;  %v474_v63 = vor.u32 %v473_v51, %v470_v50  ;;  %v487_v61 = vshll.u32 %v241_v26, 16  ;;  %v5371_v2 = vrot.slane %v5355_v48, 9 }
  0x62   : > { %v479_v58 = vrot.slane %v477_v52, 5  ;;  %v466_v6 = vsel %vm6765_vm4, %v461_v62, %v465_v38  ;;  %6118 = vmatprep.mubr.msk.bf16.mxu0 %vm685_vm3, %v5387_v55  ;;  %v2813_v5 = vsel %vm6991_vm7, %v6808_v30, %v2812_v28  ;;  %v492_v17 = vshrl.u32 %v7017_v53, 16  ;;  %v243_v52 = vld [vmem:[%s6739_s27 + $0x8c] sm:$0x1] }
  0x63   : > { %v483_v7 = vrot.slane %v481_v56, 4  ;;  %v5103_v11 = vcombine.low %v456_v15, %v466_v6  ;;  %v475_v14 = vrot.slane %v474_v63, 4  ;;  %v489_v18 = vrot.slane %v487_v61, 5 }
  0x64   : > { %v2810_v21 = vsel %vm6991_vm7, %v5371_v2, %v2809_v22  ;;  %v494_v38 = vrot.slane %v492_v17, 4  ;;  %v495_v1 = vshll.u32 %v7017_v53, 16  ;;  %v501_v30 = vshll.u32 %v7024_v16, 16  ;;  %v7056_v22 = vld [vmem:[%s8496_s1 + $0xe] sm:$0x3] }
  0x65   : > { %v484_v25 = vor.u32 %v483_v7, %v479_v58  ;;  %v5388_v31 = vcombine.low %v2810_v21, %v2813_v5  ;;  %5964 = vmatprep.mubr.msk.bf16.mxu1 %vm685_vm3, %v5103_v11  ;;  %v480_v28 = vsel %vm6765_vm4, %v475_v14, %v479_v58  ;;  %v505_v60 = vshrl.u32 %v7024_v16, 16  ;;  %v7075_v5 = vld [vmem:[%s6739_s27 + $0x90] sm:$0xf] }
  0x66   : > { %v511_v42 = vshll.u32 %v242_v57, 16  ;;  %v497_v45 = vrot.slane %v495_v1, 5  ;;  %v5372_v47 = vrot.slane %v5356_v10, 9  ;;  %v2816_v26 = vrot.slane %v6815_v46, 5  ;;  %v5357_v57 = vld [vmem:[%s6739_s27 + $0x30] sm:$0xe] }
  0x67   : > { %v485_v44 = vrot.slane %v484_v25, 4  ;;  %v503_v48 = vrot.slane %v501_v30, 5  ;;  %v507_v49 = vrot.slane %v505_v60, 4  ;;  %v2819_v51 = vrot.slane %v6824_v54, 5  ;;  %v7087_v30 = vld [vmem:[%s6739_s27 + $0x94] sm:$0xf] }
  0x68   : > { %v513_v50 = vrot.slane %v511_v42, 5  ;;  %6119 = vmatmul.mubr.msk.bf16.vlgmr.msra.gmra.mrb[0].mxu0 %vm685_vm3, %v5388_v31  ;;  %v498_v62 = vor.u32 %v497_v45, %v494_v38  ;;  %v2817_v55 = vsel %vm6991_vm7, %v5372_v47, %v2816_v26  ;;  %v2818_v56 = vrot.slane %v2816_v26, 4  ;;  %v244_v60 = vld [vmem:[%s6739_s27 + $0x98] sm:$0x1]  ;;  %v5358_v26 = vld [vmem:[%s6739_s27 + $0x3c] sm:$0xe] }
  0x69   : > { %v490_v15 = vsel %vm6765_vm4, %v485_v44, %v489_v18  ;;  %6151 = vmatpush3.bf16.msra.mxu0 %v6775_v41  ;;  %v508_v46 = vor.u32 %v507_v49, %v503_v48  ;;  %v516_v58 = vshrl.u32 %v7043_v39, 16  ;;  %v519_v54 = vshll.u32 %v7043_v39, 16 }
  0x6a   : > { %v5104_v63 = vcombine.low %v480_v28, %v490_v15  ;;  %v499_v61 = vrot.slane %v498_v62, 4  ;;  %v2820_v2 = vsel %vm6991_vm7, %v2818_v56, %v2819_v51  ;;  %v525_v6 = vshll.u32 %v7051_v43, 16  ;;  %6518 = vmatprep.subr.msk.bf16.mxu0 %vm734_vm0, %v7056_v22 }
  0x6b   : > { %v529_v7 = vshrl.u32 %v7051_v43, 16  ;;  %v509_v41 = vrot.slane %v508_v46, 4  ;;  %v5389_v17 = vcombine.low %v2817_v55, %v2820_v2  ;;  %v518_v10 = vrot.slane %v516_v58, 4  ;;  %v7107_v46 = vld [vmem:[%s6739_s27 + $0xa0] sm:$0xf] }
  0x6c   : > { %5965 = vmatmul.mubr.msk.bf16.gmra.mrb[16].mxu1 %vm685_vm3, %v5104_v63  ;;  %v521_v11 = vrot.slane %v519_v54, 5  ;;  %v504_v14 = vsel %vm6765_vm4, %v499_v61, %v503_v48  ;;  %v527_v18 = vrot.slane %v525_v6, 5  ;;  %v535_v25 = vshll.u32 %v243_v52, 16  ;;  %v7096_v52 = vld [vmem:[%s6739_s27 + $0x9c] sm:$0xf] }
  0x6d   : > { %v531_v21 = vrot.slane %v529_v7, 4  ;;  %v514_v31 = vsel %vm6765_vm4, %v509_v41, %v513_v50  ;;  %6122 = vmatprep.mubr.msk.bf16.mxu0 %vm685_vm3, %v5389_v17  ;;  %v5373_v1 = vrot.slane %v5357_v57, 9  ;;  %v2823_v28 = vrot.slane %v6844_v33, 5 }
  0x6e   : > { %v522_v38 = vor.u32 %v521_v11, %v518_v10  ;;  %v5105_v42 = vcombine.low %v504_v14, %v514_v31  ;;  %v537_v45 = vrot.slane %v535_v25, 5  ;;  %v2826_v47 = vrot.slane %v6852_v40, 5  ;;  %v245_v10 = vld [vmem:[%s6739_s27 + $0xa4] sm:$0x1]  ;;  %v5359_v11 = vld [vmem:[%s6739_s27 + $0x48] sm:$0xe] }
  0x6f   : > { %v532_v44 = vor.u32 %v531_v21, %v527_v18  ;;  %v2824_v49 = vsel %vm6991_vm7, %v5373_v1, %v2823_v28  ;;  %v2825_v50 = vrot.slane %v2823_v28, 4  ;;  %v540_v51 = vshrl.u32 %v7075_v5, 16 }
  0x70   : > { %v523_v48 = vrot.slane %v522_v38, 4  ;;  %5968 = vmatprep.mubr.msk.bf16.mxu1 %vm685_vm3, %v5105_v42  ;;  %v543_v15 = vshll.u32 %v7075_v5, 16  ;;  %v549_v62 = vshll.u32 %v7087_v30, 16  ;;  %v553_v40 = vshrl.u32 %v7087_v30, 16 }
  0x71   : > { %v533_v33 = vrot.slane %v532_v44, 4  ;;  %v2827_v56 = vsel %vm6991_vm7, %v2825_v50, %v2826_v47  ;;  %v542_v57 = vrot.slane %v540_v51, 4  ;;  %v559_v63 = vshll.u32 %v244_v60, 16 }
  0x72   : > { %v528_v55 = vsel %vm6765_vm4, %v523_v48, %v527_v18  ;;  %v5390_v54 = vcombine.low %v2824_v49, %v2827_v56  ;;  %v545_v61 = vrot.slane %v543_v15, 5  ;;  %v551_v2 = vrot.slane %v549_v62, 5  ;;  %v7133_v56 = vld [vmem:[%s6739_s27 + $0xac] sm:$0xf] }
  0x73   : > { %v538_v58 = vsel %vm6765_vm4, %v533_v33, %v537_v45  ;;  %v555_v7 = vrot.slane %v553_v40, 4  ;;  %v561_v41 = vrot.slane %v559_v63, 5  ;;  %v5374_v17 = vrot.slane %v5358_v26, 9  ;;  %v7128_v33 = vld [vmem:[%s6739_s27 + $0xa8] sm:$0xf] }
  0x74   : > { %v5106_v6 = vcombine.low %v528_v55, %v538_v58  ;;  %6123 = vmatmul.mubr.msk.bf16.gmra.mrb[4].mxu0 %vm685_vm3, %v5390_v54  ;;  %v546_v14 = vor.u32 %v545_v61, %v542_v57  ;;  %v2830_v18 = vrot.slane %v6869_v20, 5  ;;  %v2833_v21 = vrot.slane %v6874_v34, 5  ;;  %v246_v61 = vld [vmem:[%s6739_s27 + $0xb0] sm:$0x1] }
  0x75   : > { %v564_v25 = vshrl.u32 %v7096_v52, 16  ;;  %v556_v31 = vor.u32 %v555_v7, %v551_v2  ;;  %v567_v38 = vshll.u32 %v7096_v52, 16  ;;  %v573_v1 = vshll.u32 %v7107_v46, 16 }
  0x76   : > { %5969 = vmatmul.mubr.msk.bf16.gmra.mrb[20].mxu1 %vm685_vm3, %v5106_v6  ;;  %v577_v28 = vshrl.u32 %v7107_v46, 16  ;;  %v547_v60 = vrot.slane %v546_v14, 4  ;;  %v2831_v42 = vsel %vm6991_vm7, %v5374_v17, %v2830_v18  ;;  %v2832_v20 = vrot.slane %v2830_v18, 4  ;;  %v7148_v14 = vld [vmem:[%s6739_s27 + $0xb4] sm:$0xf] }
  0x77   : > { %v566_v44 = vrot.slane %v564_v25, 4  ;;  %v557_v34 = vrot.slane %v556_v31, 4  ;;  %v569_v45 = vrot.slane %v567_v38, 5  ;;  %v575_v47 = vrot.slane %v573_v1, 5 }
  0x78   : > { %v579_v26 = vrot.slane %v577_v28, 4  ;;  %v552_v48 = vsel %vm6765_vm4, %v547_v60, %v551_v2  ;;  %v2834_v49 = vsel %vm6991_vm7, %v2832_v20, %v2833_v21  ;;  %v583_v50 = vshll.u32 %v245_v10, 16  ;;  %v5360_v2 = vld [vmem:[%s6739_s27 + $0x54] sm:$0xe] }
  0x79   : > { %v5375_v51 = vrot.slane %v5359_v11, 9  ;;  %v562_v15 = vsel %vm6765_vm4, %v557_v34, %v561_v41  ;;  %v5391_v62 = vcombine.low %v2831_v42, %v2834_v49  ;;  %v570_v40 = vor.u32 %v569_v45, %v566_v44  ;;  %v7157_v42 = vld [vmem:[%s6739_s27 + $0xb8] sm:$0xf]  ;;  %v247_v49 = vld [vmem:[%s6739_s27 + $0xbc] sm:$0x1] }
  0x7a   : > { %v580_v55 = vor.u32 %v579_v26, %v575_v47  ;;  %v5107_v57 = vcombine.low %v552_v48, %v562_v15  ;;  %v585_v63 = vrot.slane %v583_v50, 5  ;;  %v2837_v58 = vrot.slane %v6892_v8, 5 }
  0x7b   : > { %v2840_v54 = vrot.slane %v6900_v23, 5  ;;  %6126 = vmatprep.mubr.msk.bf16.mxu0 %vm685_vm3, %v5391_v62  ;;  %v571_v6 = vrot.slane %v570_v40, 4  ;;  %v588_v41 = vshrl.u32 %v7128_v33, 16  ;;  %v591_v17 = vshll.u32 %v7128_v33, 16 }
  0x7c   : > { %v581_v7 = vrot.slane %v580_v55, 4  ;;  %5972 = vmatprep.mubr.msk.bf16.mxu1 %vm685_vm3, %v5107_v57  ;;  %v2838_v10 = vsel %vm6991_vm7, %v5375_v51, %v2837_v58  ;;  %v2839_v11 = vrot.slane %v2837_v58, 4  ;;  %v597_v8 = vshll.u32 %v7133_v56, 16  ;;  %v5361_v55 = vld [vmem:[%s6739_s27 + $0x60] sm:$0xe] }
  0x7d   : > { %v601_v23 = vshrl.u32 %v7133_v56, 16  ;;  %v576_v18 = vsel %vm6765_vm4, %v571_v6, %v575_v47  ;;  %v590_v25 = vrot.slane %v588_v41, 4  ;;  %v593_v31 = vrot.slane %v591_v17, 5  ;;  %v5362_v6 = vld [vmem:[%s6739_s27 + $0x6c] sm:$0xe] }
  0x7e   : > { %v586_v21 = vsel %vm6765_vm4, %v581_v7, %v585_v63  ;;  %v2841_v1 = vsel %vm6991_vm7, %v2839_v11, %v2840_v54  ;;  %v599_v28 = vrot.slane %v597_v8, 5  ;;  %v607_v34 = vshll.u32 %v246_v61, 16  ;;  %v5298_v11 = vld [vmem:[%s6739_s27 + $0x70] sm:$0xf]  ;;  %v5299_v8 = vld [vmem:[%s6739_s27 + $0x74] sm:$0x1] }
  0x7f   : > { %v5108_v38 = vcombine.low %v576_v18, %v586_v21  ;;  %v603_v60 = vrot.slane %v601_v23, 4  ;;  %v5392_v20 = vcombine.low %v2838_v10, %v2841_v1  ;;  %v594_v44 = vor.u32 %v593_v31, %v590_v25 }
  0x80   : > { %v5376_v45 = vrot.slane %v5360_v2, 9  ;;  %v2844_v26 = vrot.slane %v6923_v4, 5  ;;  %v2847_v48 = vrot.slane %v6929_v12, 5  ;;  %v612_v50 = vshrl.u32 %v7148_v14, 16 }
  0x81   : > { %5973 = vmatmul.mubr.msk.bf16.gmra.mrb[24].mxu1 %vm685_vm3, %v5108_v38  ;;  %v604_v47 = vor.u32 %v603_v60, %v599_v28  ;;  %6127 = vmatmul.mubr.msk.bf16.gmra.mrb[8].mxu0 %vm685_vm3, %v5392_v20  ;;  %v595_v51 = vrot.slane %v594_v44, 4  ;;  %v609_v15 = vrot.slane %v607_v34, 5  ;;  %v615_v62 = vshll.u32 %v7148_v14, 16 }
  0x82   : > { %v621_v40 = vshll.u32 %v7157_v42, 16  ;;  %v2845_v4 = vsel %vm6991_vm7, %v5376_v45, %v2844_v26  ;;  %v2846_v12 = vrot.slane %v2844_v26, 4  ;;  %v614_v63 = vrot.slane %v612_v50, 4 }
  0x83   : > { %v605_v57 = vrot.slane %v604_v47, 4  ;;  %v600_v58 = vsel %vm6765_vm4, %v595_v51, %v599_v28  ;;  %v617_v54 = vrot.slane %v615_v62, 5  ;;  %v625_v2 = vshrl.u32 %v7157_v42, 16  ;;  %v5363_v47 = vld [vmem:[%s6739_s27 + $0x78] sm:$0xe] }
  0x84   : > { %v623_v61 = vrot.slane %v621_v40, 5  ;;  %v2848_v41 = vsel %vm6991_vm7, %v2846_v12, %v2847_v48  ;;  %v631_v17 = vshll.u32 %v247_v49, 16  ;;  %v5377_v10 = vrot.slane %v5361_v55, 9  ;;  %v6593_v51 = vld [vmem:[%s6739_s27] sm:$0xf] }
  0x85   : > { %v610_v7 = vsel %vm6765_vm4, %v605_v57, %v609_v15  ;;  %v5393_v18 = vcombine.low %v2845_v4, %v2848_v41  ;;  %v618_v21 = vor.u32 %v617_v54, %v614_v63  ;;  %v627_v25 = vrot.slane %v625_v2, 4  ;;  %v7195_v15 = vld [vmem:[%s6739_s27 + $0x4] sm:$0xf]  ;;  %v7199_v40 = vld [vmem:[%s6739_s27 + $0x7c] sm:$0xf] }
  0x86   : > { %v5109_v23 = vcombine.low %v600_v58, %v610_v7  ;;  %v633_v31 = vrot.slane %v631_v17, 5  ;;  %v2851_v38 = vrot.slane %v6953_v59, 5  ;;  %v2854_v1 = vrot.slane %v6960_v9, 5  ;;  %v7202_v55 = vld [vmem:[%s6739_s27 + $0x80] sm:$0x1] }
  0x87   : > { %v5378_v28 = vrot.slane %v5362_v6, 9  ;;  %6130 = vmatprep.mubr.msk.bf16.mxu0 %vm685_vm3, %v5393_v18  ;;  %v619_v60 = vrot.slane %v618_v21, 4  ;;  %v628_v20 = vor.u32 %v627_v25, %v623_v61  ;;  %v2858_v44 = vrot.slane %v5298_v11, 5  ;;  %v5304_v57 = vld [vmem:[%s6739_s27 + $0x88] sm:$0xf] }
  0x88   : > { %5976 = vmatprep.mubr.msk.bf16.mxu1 %vm685_vm3, %v5109_v23  ;;  %v2861_v34 = vrot.slane %v5299_v8, 5  ;;  %v2852_v45 = vsel %vm6991_vm7, %v5377_v10, %v2851_v38  ;;  %v2853_v59 = vrot.slane %v2851_v38, 4  ;;  %v5127_v62 = vcombine.low %v6593_v51, %v7195_v15  ;;  %v5305_v54 = vld [vmem:[%s6739_s27 + $0x8c] sm:$0x1]  ;;  %v5307_v17 = vld [vmem:[%s6739_s27 + $0x94] sm:$0xf] }
  0x89   : > { %v624_v9 = vsel %vm6765_vm4, %v619_v60, %v623_v61  ;;  %v629_v26 = vrot.slane %v628_v20, 4  ;;  %v2859_v48 = vsel %vm6991_vm7, %v5378_v28, %v2858_v44  ;;  %v2860_v49 = vrot.slane %v2858_v44, 4  ;;  %v5364_v61 = vld [vmem:[%s6739_s27 + $0x84] sm:$0xe]  ;;  %v5365_v23 = vld [vmem:[%s6739_s27 + $0x90] sm:$0xe] }
  0x8a   : > { %v2855_v50 = vsel %vm6991_vm7, %v2853_v59, %v2854_v1  ;;  %v5379_v58 = vrot.slane %v5363_v47, 9  ;;  %v2865_v7 = vrot.slane %v7199_v40, 5  ;;  %v2868_v41 = vrot.slane %v7202_v55, 5  ;;  %v5308_v25 = vld [vmem:[%s6739_s27 + $0x98] sm:$0x1] }
  0x8b   : > { %v634_v4 = vsel %vm6765_vm4, %v629_v26, %v633_v31  ;;  %v5394_v12 = vcombine.low %v2852_v45, %v2855_v50  ;;  %v2862_v63 = vsel %vm6991_vm7, %v2860_v49, %v2861_v34  ;;  %v5380_v10 = vrot.slane %v5364_v61, 9  ;;  %v5310_v31 = vld [vmem:[%s6739_s27 + $0xa0] sm:$0xf]  ;;  %v5311_v60 = vld [vmem:[%s6739_s27 + $0xa4] sm:$0x1] }
  0x8c   : > { %v5110_v2 = vcombine.low %v624_v9, %v634_v4  ;;  %v5395_v6 = vcombine.low %v2859_v48, %v2862_v63  ;;  %v2872_v11 = vrot.slane %v5304_v57, 5  ;;  %v2875_v8 = vrot.slane %v5305_v54, 5  ;;  %v5366_v20 = vld [vmem:[%s6739_s27 + $0x9c] sm:$0xe]  ;;  %v6595_v44 = vld [vmem:[%s6739_s27 + $0xc] sm:$0xf] }
  0x8d   : > { %6131 = vmatmul.mubr.msk.bf16.gmra.mrb[12].mxu0 %vm685_vm3, %v5394_v12  ;;  %v2866_v18 = vsel %vm6991_vm7, %v5379_v58, %v2865_v7  ;;  %v2867_v21 = vrot.slane %v2865_v7, 4  ;;  %v2879_v28 = vrot.slane %v5307_v17, 5  ;;  %v7229_v34 = vld [vmem:[%s6739_s27 + $0x10] sm:$0xf]  ;;  %v6597_v47 = vld [vmem:[%s6739_s27 + $0x18] sm:$0xf] }
  0x8e   : > { %5977 = vmatmul.mubr.msk.bf16.gmra.mrb[28].mxu1 %vm685_vm3, %v5110_v2  ;;  %6134 = vmatprep.mubr.msk.bf16.mxu0 %vm685_vm3, %v5395_v6  ;;  %v2873_v38 = vsel %vm6991_vm7, %v5380_v10, %v2872_v11  ;;  %v2874_v1 = vrot.slane %v2872_v11, 4  ;;  %v5128_v45 = vcombine.low %v6595_v44, %v7229_v34  ;;  %v7236_v9 = vld [vmem:[%s6739_s27 + $0x1c] sm:$0xf]  ;;  %v5381_v48 = vrot.slane %v5365_v23, 9  ;;  %v5313_v57 = vld [vmem:[%s6739_s27 + $0xac] sm:$0xf] }
  0x8f   : > { %5982 = vmatprep.mubr.msk.bf16.mxu1 %vm685_vm3, %v5127_v62  ;;  %v2869_v59 = vsel %vm6991_vm7, %v2867_v21, %v2868_v41  ;;  %v5129_v26 = vcombine.low %v6597_v47, %v7236_v9  ;;  %v2881_v51 = vrot.slane %v2879_v28, 4  ;;  %v2882_v62 = vrot.slane %v5308_v25, 5  ;;  %v6599_v54 = vld [vmem:[%s8496_s1 + $0x4] sm:$0x3]  ;;  %v5316_v2 = vld [vmem:[%s6739_s27 + $0xb8] sm:$0xf] }
  0x90   : > { %v5396_v49 = vcombine.low %v2866_v18, %v2869_v59  ;;  %v2876_v50 = vsel %vm6991_vm7, %v2874_v1, %v2875_v8  ;;  %v5382_v12 = vrot.slane %v5366_v20, 9  ;;  %v2886_v63 = vrot.slane %v5310_v31, 5  ;;  %v7251_v7 = vld [vmem:[%s8496_s1 + $0x6] sm:$0x3]  ;;  %v5314_v10 = vld [vmem:[%s6739_s27 + $0xb0] sm:$0x1] }
  0x91   : > { %v5397_v4 = vcombine.low %v2873_v38, %v2876_v50  ;;  %v2889_v58 = vrot.slane %v5311_v60, 5  ;;  %v1453_v61 = vsel %vm734_vm0, %v6599_v54, 0  ;;  %v2880_v41 = vsel %vm6991_vm7, %v5381_v48, %v2879_v28  ;;  %v5367_v11 = vld [vmem:[%s6739_s27 + $0xa8] sm:$0xe]  ;;  %v5317_v25 = vld [vmem:[%s6739_s27 + $0xbc] sm:$0x1] }
  0x92   : > { %v2888_v6 = vrot.slane %v2886_v63, 4  ;;  %v2883_v17 = vsel %vm6991_vm7, %v2881_v51, %v2882_v62  ;;  %v2893_v8 = vrot.slane %v5313_v57, 5  ;;  %v2887_v23 = vsel %vm6991_vm7, %v5382_v12, %v2886_v63  ;;  %v5368_v31 = vld [vmem:[%s6739_s27 + $0xb4] sm:$0xe]  ;;  %v6600_v38 = vld [vmem:[%s6739_s27 + $0x24] sm:$0xf] }
  0x93   : > { %v2900_v21 = vrot.slane %v5316_v2, 5  ;;  %v7272_v1 = vld [vmem:[%s6739_s27 + $0x28] sm:$0xf]  ;;  %v5398_v60 = vcombine.low %v2880_v41, %v2883_v17  ;;  %v5383_v44 = vrot.slane %v5367_v11, 9  ;;  %v2896_v59 = vrot.slane %v5314_v10, 5 }
  0x94   : > { %v2890_v18 = vsel %vm6991_vm7, %v2888_v6, %v2889_v58  ;;  %v5130_v28 = vcombine.low %v6600_v38, %v7272_v1  ;;  %v6602_v47 = vld [vmem:[%s6739_s27 + $0x30] sm:$0xf]  ;;  %v2903_v51 = vrot.slane %v5317_v25, 5  ;;  %v5319_v62 = vld [vmem:[%s6739_s27 + $0xc4] sm:$0xf]  ;;  %v2288_v25 = vshrl.u32 %v7199_v40, 16 }
  0x95   : > { %6135 = vmatmul.mubr.msk.bf16.gmra.mrb[16].mxu0 %vm685_vm3, %v5396_v49  ;;  %v5399_v20 = vcombine.low %v2887_v23, %v2890_v18  ;;  %v5384_v49 = vrot.slane %v5368_v31, 9  ;;  %v2902_v50 = vrot.slane %v2900_v21, 4  ;;  %v2894_v57 = vsel %vm6991_vm7, %v5383_v44, %v2893_v8  ;;  %v5369_v12 = vld [vmem:[%s6739_s27 + $0xc0] sm:$0xe]  ;;  %v6604_v41 = vld [vmem:[%s6739_s27 + $0x3c] sm:$0xf] }
  0x96   : > { %5983 = vmatmul.mubr.msk.bf16.vlgmr.msra.gmra.mrb[0].mxu1 %vm685_vm3, %v5128_v45  ;;  %6138 = vmatprep.mubr.msk.bf16.mxu0 %vm685_vm3, %v5397_v4  ;;  %v2895_v45 = vrot.slane %v2893_v8, 4  ;;  %v2907_v63 = vrot.slane %v5319_v62, 5  ;;  %v5385_v6 = vrot.slane %v5369_v12, 9  ;;  %v7297_v17 = vld [vmem:[%s6739_s27 + $0x40] sm:$0xf]  ;;  %v5133_v18 = vcombine.low %v6904_v27, %v6907_v36  ;;  %v6556_v62 = vld [vmem:[%s6739_s27 + $0x24] sm:$0xff]  }
  0x97   : > { %6015 = vmatpush3.bf16.msra.mxu1 %v1453_v61  ;;  %5986 = vmatprep.mubr.msk.bf16.mxu1 %vm685_vm3, %v5129_v26  ;;  %v7277_v26 = vld [vmem:[%s6739_s27 + $0x34] sm:$0xf]  ;;  %v2901_v58 = vsel %vm6991_vm7, %v5384_v49, %v2900_v21  ;;  %v2904_v54 = vsel %vm6991_vm7, %v2902_v50, %v2903_v51  ;;  %v5320_v61 = vld [vmem:[%s6739_s27 + $0xc8] sm:$0x1]  ;;  %v5132_v10 = vcombine.low %v6604_v41, %v7297_v17  ;;  %v2284_v21 = vshll.u32 %v7199_v40, 16 }
  0x98   : > { %6513 = vmatprep.subr.msk.bf16.mxu1 %vm734_vm0, %v7251_v7  ;;  %v5131_v48 = vcombine.low %v6602_v47, %v7277_v26  ;;  %v2897_v4 = vsel %vm6991_vm7, %v2895_v45, %v2896_v59  ;;  %v5401_v11 = vcombine.low %v2901_v58, %v2904_v54  ;;  %v2909_v8 = vrot.slane %v2907_v63, 4  ;;  %v1191_v45 = vld [vmem:[%s6739_s27] sm:$0xe]  ;;  %v1192_v59 = vld [vmem:[%s6739_s27 + $0xc] sm:$0xe] }
  0x99   : > { %v5400_v2 = vcombine.low %v2894_v57, %v2897_v4  ;;  %v2910_v23 = vrot.slane %v5320_v61, 5  ;;  %v2908_v31 = vsel %vm6991_vm7, %v5385_v6, %v2907_v63  ;;  %v7312_v27 = vrot.slane %v2284_v21, 5  ;;  %v1195_v41 = vld [vmem:[%s6739_s27 + $0x30] sm:$0xe] }
  0x9a   : > { %v2290_v36 = vrot.slane %v2288_v25, 4  ;;  %v5135_v44 = vcombine.low %v6964_v19, %v6970_v35  ;;  %v2294_v47 = vshll.u32 %v7202_v55, 16  ;;  %v5159_v19 = vrot.slane %v1191_v45, 9 }
  0x9b   : > { %v2911_v38 = vsel %vm6991_vm7, %v2909_v8, %v2910_v23  ;;  %8517 = vst [vmem:[#allocation3_spill] sm:$0xff] %v7312_v27  ;;  %v5160_v35 = vrot.slane %v1192_v59, 9  ;;  %v1258_v4 = vrot.slane %v7236_v9, 5  ;;  %v1265_v12 = vrot.slane %v7272_v1, 5  ;;  %v1196_v8 = vld [vmem:[%s6739_s27 + $0x3c] sm:$0xe] }
  0x9c   : > { %v5402_v40 = vcombine.low %v2908_v31, %v2911_v38  ;;  %v2291_v49 = vor.u32 %v2290_v36, %v7312_v27  ;;  %v7332_v51 = vrot.slane %v2294_v47, 5  ;;  %v5136_v58 = vcombine.low %v6985_v0, %v6998_v29  ;;  %v1197_v31 = vld [vmem:[%s6739_s27 + $0x48] sm:$0xe]  ;;  %v6610_v59 = vld [vmem:[%s6739_s27 + $0x38] sm:$0x1] }
  0x9d   : > { %6139 = vmatmul.mubr.msk.bf16.gmra.mrb[20].mxu0 %vm685_vm3, %v5398_v60  ;;  %v5134_v60 = vcombine.low %v6933_v24, %v6939_v37  ;;  %v6607_v24 = vld [vmem:[%s6739_s27 + $0x14] sm:$0x1]  ;;  %v4099_v54 = vsel %vm734_vm0, %v7056_v22, 0  ;;  %v5137_v61 = vcombine.low %v7017_v53, %v7024_v16  ;;  %v5138_v6 = vcombine.low %v7043_v39, %v7051_v43  ;;  %v6608_v16 = vld [vmem:[%s6739_s27 + $0x20] sm:$0x1] }
  0x9e   : > { %5987 = vmatmul.mubr.msk.bf16.gmra.mrb[4].mxu1 %vm685_vm3, %v5130_v28  ;;  %6142 = vmatprep.mubr.msk.bf16.mxu0 %vm685_vm3, %v5399_v20  ;;  %v1251_v28 = vrot.slane %v7229_v34, 5  ;;  %v6554_v20 = vld [vmem:[%s6739_s27 + $0x18] sm:$0xff]   ;;  %v6606_v34 = vld [vmem:[%s6739_s27 + $0x8] sm:$0x1]  ;;  %v1254_v37 = vrot.slane %v6607_v24, 5  ;;  %8518 = vst [vmem:[#allocation4_spill] sm:$0xff] %v7332_v51  ;;  %v5139_v9 = vcombine.low %v7075_v5, %v7087_v30 }
  0x9f   : > { %5990 = vmatprep.mubr.msk.bf16.mxu1 %vm685_vm3, %v5131_v48  ;;  %v1244_v48 = vrot.slane %v7195_v15, 5  ;;  %v1247_v50 = vrot.slane %v6606_v34, 5  ;;  %v1193_v15 = vld [vmem:[%s6739_s27 + $0x18] sm:$0xe]  ;;  %v7337_v63 = vrot.slane %v2291_v49, 4  ;;  %v1261_v22 = vrot.slane %v6608_v16, 5 }
  0xa0   : > { %v1253_v55 = vrot.slane %v1251_v28, 4  ;;  %v5161_v1 = vrot.slane %v1193_v15, 9  ;;  %v7359_v29 = vsel %vm6991_vm7, %v5160_v35, %v1251_v28  ;;  %v1267_v25 = vrot.slane %v1265_v12, 4  ;;  %v5484_v24 = vld [vmem:[%s6739_s27 + $0x18] sm:$0xf] }
  0xa1   : > { %v1246_v57 = vrot.slane %v1244_v48, 4  ;;  %8519 = vst [vmem:[#allocation5_spill] sm:$0xff] %v7337_v63  ;;  %v7355_v0 = vsel %vm6991_vm7, %v5159_v19, %v1244_v48  ;;  %v1275_v47 = vrot.slane %v6610_v59, 5  ;;  %v7396_v49 = vsel %vm734_vm0, %v7251_v7, 0  ;;  %v5485_v7 = vld [vmem:[%s6739_s27 + $0x1c] sm:$0xf] }
  0xa2   : > { %v7363_v53 = vsel %vm6991_vm7, %v1253_v55, %v1254_v37  ;;  %v7400_v34 = vsel %vm6991_vm7, %v5161_v1, %v1258_v4  ;;  %v6560_v37 = vld [vmem:[%s6739_s27 + $0x3c] sm:$0xff]   ;;  %v5164_v35 = vrot.slane %v1196_v8, 9  ;;  %v6611_v55 = vld [vmem:[%s6739_s27 + $0x44] sm:$0x1]  ;;  %v3620_v8 = vshll.u32 %v5484_v24, 16 }
  0xa3   : > { %v7374_v23 = vsel %vm6991_vm7, %v1246_v57, %v1247_v50  ;;  %v1198_v50 = vld [vmem:[%s6739_s27 + $0x54] sm:$0xe]  ;;  %v1282_v15 = vrot.slane %v6611_v55, 5  ;;  %v5488_v39 = vld [vmem:[%s6739_s27 + $0x28] sm:$0xf] }
  0xa4   : > { %v6618_v5 = vld [vmem:[%s6739_s27 + $0x70] sm:$0xf] }
  0xa5   : > { %6143 = vmatmul.mubr.msk.bf16.gmra.mrb[24].mxu0 %vm685_vm3, %v5400_v2  ;;  %v1194_v2 = vld [vmem:[%s6739_s27 + $0x24] sm:$0xe]  ;;  %v1307_v30 = vrot.slane %v6618_v5, 5 }
  0xa6   : > { %5991 = vmatmul.mubr.msk.bf16.gmra.mrb[8].mxu1 %vm685_vm3, %v5132_v10  ;;  %6146 = vmatprep.mubr.msk.bf16.mxu0 %vm685_vm3, %v5401_v11  ;;  %v1272_v10 = vrot.slane %v7277_v26, 5  ;;  %v6558_v11 = vld [vmem:[%s6739_s27 + $0x30] sm:$0xff]   ;;  %v5162_v21 = vrot.slane %v1194_v2, 9 }
  0xa7   : > { %5994 = vmatprep.mubr.msk.bf16.mxu1 %vm685_vm3, %v5133_v18  ;;  %v7370_v26 = vld [vmem:[%s8496_s1 + $0x10] sm:$0x3]  ;;  %v1260_v18 = vrot.slane %v1258_v4, 4  ;;  %v1309_v48 = vrot.slane %v1307_v30, 4 }
  0xa8   : > { %v1274_v45 = vrot.slane %v1272_v10, 4  ;;  %v7407_v19 = vsel %vm6991_vm7, %v5162_v21, %v1265_v12  ;;  %v3630_v21 = vshrl.u32 %v5485_v7, 16 }
  0xa9   : > { %v7416_v4 = vsel %vm6991_vm7, %v1260_v18, %v1261_v22  ;;  %v3617_v22 = vshrl.u32 %v5484_v24, 16  ;;  %v3626_v18 = vshll.u32 %v5485_v7, 16  ;;  %v5487_v24 = vld [vmem:[%s6739_s27 + $0x24] sm:$0xf] }
  0xaa   : > { %v7429_v1 = vsel %vm6991_vm7, %v1274_v45, %v1275_v47 }
  0xab   : > { %v3619_v43 = vrot.slane %v3617_v22, 4  ;;  %v7471_v7 = vrot.slane %v3626_v18, 5  ;;  %v3644_v22 = vshll.u32 %v5487_v24, 16  ;;  %v3654_v18 = vshrl.u32 %v5488_v39, 16 }
  0xad   : > { %6147 = vmatmul.mubr.msk.bf16.gmra.mrb[28].mxu0 %vm685_vm3, %v5402_v40  ;;  %v6609_v40 = vld [vmem:[%s6739_s27 + $0x2c] sm:$0x1]  ;;  %v3646_v27 = vrot.slane %v3644_v22, 5 }
  0xae   : > { %5995 = vmatmul.mubr.msk.bf16.gmra.mrb[12].mxu1 %vm685_vm3, %v5134_v60  ;;  %6152 = vmatprep.mubr.msk.bf16.mxu0 %vm685_vm3, %v6554_v20  ;;  %v1268_v28 = vrot.slane %v6609_v40, 5  ;;  %v1279_v60 = vrot.slane %v7297_v17, 5  ;;  %v6614_v40 = vld [vmem:[%s6739_s27 + $0x50] sm:$0x1]  ;;  %v6619_v17 = vld [vmem:[%s6739_s27 + $0x74] sm:$0x1] }
  0xaf   : > { %5998 = vmatprep.mubr.msk.bf16.mxu1 %vm685_vm3, %v5135_v44  ;;  %v5163_v44 = vrot.slane %v1195_v41, 9  ;;  %v5166_v41 = vrot.slane %v1198_v50, 9  ;;  %v1199_v50 = vld [vmem:[%s6739_s27 + $0x60] sm:$0xe]  ;;  %v5489_v20 = vld [vmem:[%s6739_s27 + $0x2c] sm:$0x1] }
  0xb0   : > { %v1281_v12 = vrot.slane %v1279_v60, 4  ;;  %v7442_v45 = vsel %vm6991_vm7, %v5164_v35, %v1279_v60  ;;  %v6615_v35 = vld [vmem:[%s6739_s27 + $0x5c] sm:$0x1] }
  0xb1   : > { %v7425_v2 = vsel %vm6991_vm7, %v5163_v44, %v1272_v10  ;;  %v1296_v55 = vrot.slane %v6615_v35, 5  ;;  %v1200_v35 = vld [vmem:[%s6739_s27 + $0x6c] sm:$0xe] }
  0xb2   : > { %v7446_v59 = vsel %vm6991_vm7, %v1281_v12, %v1282_v15  ;;  %v6616_v15 = vld [vmem:[%s6739_s27 + $0x64] sm:$0xf]  ;;  %v3632_v12 = vrot.slane %v3630_v21, 4  ;;  %v5168_v5 = vrot.slane %v1200_v35, 9 }
  0xb3   : > { %v6566_v21 = vld [vmem:[%s6739_s27 + $0x60] sm:$0xff]  }
  0xb5   : > { %6153 = vmatmul.mubr.msk.bf16.vlgmr.msra.gmra.mrb[0].mxu0 %vm685_vm3, %v6556_v62  ;;  %v6612_v62 = vld [vmem:[%s6739_s27 + $0x4c] sm:$0xf] }
  0xb6   : > { %5999 = vmatmul.mubr.msk.bf16.gmra.mrb[16].mxu1 %vm685_vm3, %v5136_v58  ;;  %6185 = vmatpush3.bf16.msra.mxu0 %v4099_v54  ;;  %v1286_v57 = vrot.slane %v6612_v62, 5  ;;  %v7420_v58 = vsel %vm6991_vm7, %v1267_v25, %v1268_v28  ;;  %v5165_v54 = vrot.slane %v1197_v31, 9  ;;  %v1289_v28 = vrot.slane %v6614_v40, 5 }
  0xb7   : > { %6002 = vmatprep.mubr.msk.bf16.mxu1 %vm685_vm3, %v5137_v61  ;;  %6156 = vmatprep.mubr.msk.bf16.mxu0 %vm685_vm3, %v6558_v11  ;;  %v6562_v61 = vld [vmem:[%s6739_s27 + $0x48] sm:$0xff]   ;;  %v6613_v11 = vld [vmem:[%s6739_s27 + $0x58] sm:$0xf]  ;;  %v1300_v62 = vrot.slane %v6616_v15, 5  ;;  %v5491_v15 = vld [vmem:[%s6739_s27 + $0x34] sm:$0xf] }
  0xb8   : > { %6519 = vmatprep.subr.msk.bf16.mxu0 %vm734_vm0, %v7370_v26  ;;  %v1293_v16 = vrot.slane %v6613_v11, 5  ;;  %v1288_v31 = vrot.slane %v1286_v57, 4  ;;  %v7450_v47 = vsel %vm6991_vm7, %v5165_v54, %v1286_v57  ;;  %v5486_v57 = vld [vmem:[%s6739_s27 + $0x20] sm:$0x1]  ;;  %v5490_v54 = vld [vmem:[%s6739_s27 + $0x30] sm:$0xf] }
  0xb9   : > { %v5167_v11 = vrot.slane %v1199_v50, 9  ;;  %v3668_v50 = vshll.u32 %v5490_v54, 16  ;;  %v3636_v25 = vshll.u32 %v5486_v57, 16  ;;  %v3674_v36 = vshll.u32 %v5491_v15, 16 }
  0xba   : > { %v7461_v60 = vsel %vm6991_vm7, %v5166_v41, %v1293_v16  ;;  %v7477_v41 = vsel %vm6991_vm7, %v1288_v31, %v1289_v28  ;;  %v1302_v31 = vrot.slane %v1300_v62, 4  ;;  %v3665_v28 = vshrl.u32 %v5490_v54, 16 }
  0xbb   : > { %v7519_v35 = vrot.slane %v3674_v36, 5 }
  0xbd   : > { %6157 = vmatmul.mubr.msk.bf16.gmra.mrb[4].mxu0 %vm685_vm3, %v6560_v37  ;;  %v1295_v37 = vrot.slane %v1293_v16, 4  ;;  %v6617_v16 = vld [vmem:[%s6739_s27 + $0x68] sm:$0x1] }
  0xbe   : > { %6003 = vmatmul.mubr.msk.bf16.gmra.mrb[20].mxu1 %vm685_vm3, %v5138_v6  ;;  %6160 = vmatprep.mubr.msk.bf16.mxu0 %vm685_vm3, %v6562_v61  ;;  %v3622_v6 = vrot.slane %v3620_v8, 5  ;;  %v6564_v61 = vld [vmem:[%s6739_s27 + $0x54] sm:$0xff]   ;;  %v1303_v40 = vrot.slane %v6617_v16, 5  ;;  %v3650_v8 = vshll.u32 %v5488_v39, 16  ;;  %v3633_v16 = vor.u32 %v3632_v12, %v7471_v7 }
  0xbf   : > { %6006 = vmatprep.mubr.msk.bf16.mxu1 %vm685_vm3, %v5139_v9  ;;  %v3641_v9 = vshrl.u32 %v5487_v24, 16  ;;  %v7486_v44 = vsel %vm6991_vm7, %v1295_v37, %v1296_v55  ;;  %v1310_v24 = vrot.slane %v6619_v17, 5  ;;  %v3678_v39 = vshrl.u32 %v5491_v15, 16 }
  0xc0   : > { %v3623_v10 = vor.u32 %v3622_v6, %v3619_v43  ;;  %v7492_v37 = vrot.slane %v3650_v8, 5  ;;  %v3656_v55 = vrot.slane %v3654_v18, 4  ;;  %v8520_v43 = vcombine.low %v7096_v52, %v7107_v46  ;;  %v6620_v8 = vld [vmem:[%s6739_s27 + $0x7c] sm:$0xf]  ;;  %v7528_v18 = vld [vmem:[%s6739_s27 + $0x38] sm:$0x1] }
  0xc1   : > { %v3643_v38 = vrot.slane %v3641_v9, 4  ;;  %v7501_v17 = vsel %vm6991_vm7, %v5167_v11, %v1300_v62  ;;  %v7505_v57 = vsel %vm6991_vm7, %v1302_v31, %v1303_v40  ;;  %v3667_v6 = vrot.slane %v3665_v28, 4  ;;  %8522 = vst [vmem:[#allocation6_spill] sm:$0xff] %v7528_v18 }
  0xc2   : > { %v3670_v12 = vrot.slane %v3668_v50, 5  ;;  %v8521_v52 = vcombine.low %v7128_v33, %v7133_v56  ;;  %v3624_v46 = vrot.slane %v3623_v10, 4  ;;  %v3634_v54 = vrot.slane %v3633_v16, 4  ;;  %v6568_v33 = vld [vmem:[%s6739_s27 + $0x6c] sm:$0xff]   ;;  %v1202_v16 = vld [vmem:[%s6739_s27 + $0x84] sm:$0xe] }
  0xc3   : > { %v3660_v62 = vshll.u32 %v5489_v20, 16  ;;  %v7513_v11 = vsel %vm6991_vm7, %v5168_v5, %v1307_v30  ;;  %v7517_v40 = vsel %vm6991_vm7, %v1309_v48, %v1310_v24  ;;  %v3680_v9 = vrot.slane %v3678_v39, 4  ;;  %v6569_v48 = vld [vmem:[%s6739_s27 + $0x78] sm:$0xff]  }
  0xc4   : > { %v3647_v10 = vor.u32 %v3646_v27, %v3643_v38  ;;  %v3657_v20 = vor.u32 %v3656_v55, %v7492_v37  ;;  %v1314_v30 = vrot.slane %v6620_v8, 5  ;;  %v3671_v38 = vor.u32 %v3670_v12, %v3667_v6  ;;  %v5493_v5 = vld [vmem:[%s6739_s27 + $0x3c] sm:$0xf] }
  0xc5   : > { %6161 = vmatmul.mubr.msk.bf16.gmra.mrb[8].mxu0 %vm685_vm3, %v6564_v61  ;;  %v3638_v61 = vrot.slane %v3636_v25, 5  ;;  %v1201_v25 = vld [vmem:[%s6739_s27 + $0x78] sm:$0xe]  ;;  %v7544_v50 = vrot.slane %v3660_v62, 5  ;;  %v3681_v39 = vor.u32 %v3680_v9, %v7519_v35  ;;  %v3684_v55 = vshll.u32 %v7528_v18, 16 }
  0xc6   : > { %6007 = vmatmul.mubr.msk.bf16.gmra.mrb[24].mxu1 %vm685_vm3, %v8520_v43  ;;  %6164 = vmatprep.mubr.msk.bf16.mxu0 %vm685_vm3, %v6566_v21  ;;  %v3629_v21 = vsel %vm6765_vm4, %v3624_v46, %v7471_v7  ;;  %v5169_v24 = vrot.slane %v1201_v25, 9  ;;  %v6621_v43 = vld [vmem:[%s6739_s27 + $0x88] sm:$0xf]  ;;  %v7552_v7 = vld [vmem:[%s6739_s27 + $0x40] sm:$0xf]  ;;  %v3648_v12 = vrot.slane %v3647_v10, 4  ;;  %v8524_v62 = vcombine.low %v7148_v14, %v7157_v42 }
  0xc7   : > { %6010 = vmatprep.mubr.msk.bf16.mxu1 %vm685_vm3, %v8521_v52  ;;  %v3639_v31 = vsel %vm6765_vm4, %v3634_v54, %v3638_v61  ;;  %v1321_v6 = vrot.slane %v6621_v43, 5  ;;  %8523 = vst [vmem:[#allocation7_spill] sm:$0xff] %v7552_v7  ;;  %v3658_v52 = vrot.slane %v3657_v20, 4  ;;  %v1316_v46 = vrot.slane %v1314_v30, 4  ;;  %v6622_v54 = vld [vmem:[%s6739_s27 + $0x80] sm:$0x1] }
  0xc8   : > { %v1317_v61 = vrot.slane %v6622_v54, 5  ;;  %v3672_v9 = vrot.slane %v3671_v38, 4  ;;  %v5170_v25 = vrot.slane %v1202_v16, 9  ;;  %v3689_v8 = vshrl.u32 %v5493_v5, 16  ;;  %v6570_v10 = vld [vmem:[%s6739_s27 + $0x84] sm:$0xff]  }
  0xc9   : > { %v3692_v43 = vshll.u32 %v5493_v5, 16  ;;  %v7566_v20 = vcombine.low %v3629_v21, %v3639_v31  ;;  %v7570_v14 = vsel %vm734_vm0, %v7370_v26, 0  ;;  %v3702_v38 = vshrl.u32 %v7552_v7, 16  ;;  %v6571_v21 = vld [vmem:[%s6739_s27 + $0x90] sm:$0xff]   ;;  %v6627_v18 = vld [vmem:[%s6739_s27 + $0xa0] sm:$0xf] }
  0xca   : > { %v3682_v16 = vrot.slane %v3681_v39, 4  ;;  %v3686_v5 = vrot.slane %v3684_v55, 5  ;;  %v1323_v54 = vrot.slane %v1321_v6, 4  ;;  %v3653_v31 = vsel %vm6765_vm4, %v3648_v12, %v7492_v37 }
  0xcb   : > { %v3663_v26 = vsel %vm6765_vm4, %v3658_v52, %v7544_v50  ;;  %v7585_v39 = vsel %vm6991_vm7, %v5169_v24, %v1314_v30  ;;  %v7589_v55 = vsel %vm6991_vm7, %v1316_v46, %v1317_v61  ;;  %v3677_v37 = vsel %vm6765_vm4, %v3672_v9, %v7519_v35  ;;  %v5499_v30 = vld [vmem:[%s6739_s27 + $0x54] sm:$0xf]  ;;  %v7606_v24 = vld [vmem:[%s6739_s27 + $0x58] sm:$0xf]  ;;  %v7611_v61 = vld [vmem:[%s6739_s27 + $0x90] sm:$0xe] }
  0xcc   : > { %v7602_v12 = vsel %vm6991_vm7, %v5170_v25, %v1321_v6  ;;  %v3691_v50 = vrot.slane %v3689_v8, 4  ;;  %v3694_v52 = vrot.slane %v3692_v43, 5  ;;  %v3704_v46 = vrot.slane %v3702_v38, 4 }
  0xcd   : > { %6165 = vmatmul.mubr.msk.bf16.gmra.mrb[12].mxu0 %vm685_vm3, %v6568_v33  ;;  %v8525_v33 = vcombine.low %v7355_v0, %v7374_v23  ;;  %v6623_v0 = vld [vmem:[%s6739_s27 + $0x8c] sm:$0x1]  ;;  %v3687_v36 = vsel %vm6765_vm4, %v3682_v16, %v3686_v5  ;;  %v3737_v25 = vshrl.u32 %v5499_v30, 16  ;;  %v3740_v8 = vshll.u32 %v5499_v30, 16 }
  0xce   : > { %6011 = vmatmul.mubr.msk.bf16.gmra.mrb[28].mxu1 %vm685_vm3, %v8524_v62  ;;  %6168 = vmatprep.mubr.msk.bf16.mxu0 %vm685_vm3, %v6569_v48  ;;  %v3698_v48 = vshll.u32 %v7552_v7, 16  ;;  %v1324_v23 = vrot.slane %v6623_v0, 5  ;;  %v5496_v62 = vld [vmem:[%s6739_s27 + $0x48] sm:$0xf]  ;;  %v7595_v0 = vld [vmem:[%s6739_s27 + $0x4c] sm:$0xf]  ;;  %v8527_v38 = vcombine.low %v7359_v29, %v7363_v53  ;;  %v7629_v16 = vcombine.low %v3653_v31, %v3663_v26 }
  0xcf   : > { %6016 = vmatprep.mubr.msk.bf16.mxu1 %vm685_vm3, %v8525_v33  ;;  %v7592_v33 = vld [vmem:[%s6739_s27 + $0x44] sm:$0x1]  ;;  %v3713_v27 = vshrl.u32 %v5496_v62, 16  ;;  %v3716_v15 = vshll.u32 %v5496_v62, 16  ;;  %v3722_v6 = vshll.u32 %v7595_v0, 16  ;;  %v3726_v9 = vshrl.u32 %v7595_v0, 16 }
  0xd0   : > { %8526 = vst [vmem:[#allocation8_spill] sm:$0xff] %v7592_v33  ;;  %v7608_v28 = vrot.slane %v3698_v48, 5  ;;  %v7617_v35 = vsel %vm6991_vm7, %v1323_v54, %v1324_v23  ;;  %v3746_v43 = vshll.u32 %v7606_v24, 16  ;;  %v3750_v48 = vshrl.u32 %v7606_v24, 16  ;;  %v5502_v31 = vld [vmem:[%s6739_s27 + $0x60] sm:$0xf] }
  0xd1   : > { %v3708_v5 = vshll.u32 %v7592_v33, 16  ;;  %v5171_v54 = vrot.slane %v7611_v61, 9  ;;  %v8528_v23 = vcombine.low %v7400_v34, %v7416_v4  ;;  %v7640_v29 = vcombine.low %v3677_v37, %v3687_v36  ;;  %v6572_v26 = vld [vmem:[%s6739_s27 + $0x9c] sm:$0xff]   ;;  %v6573_v30 = vld [vmem:[%s6739_s27 + $0xa8] sm:$0xff]  }
  0xd2   : > { %v3695_v53 = vor.u32 %v3694_v52, %v3691_v50  ;;  %v3715_v62 = vrot.slane %v3713_v27, 4  ;;  %v7651_v34 = vrot.slane %v3722_v6, 5  ;;  %v3728_v4 = vrot.slane %v3726_v9, 4  ;;  %v6624_v36 = vld [vmem:[%s8496_s1 + $0x8] sm:$0x3] }
  0xd3   : > { %v3739_v27 = vrot.slane %v3737_v25, 4  ;;  %v3742_v37 = vrot.slane %v3740_v8, 5  ;;  %v7660_v50 = vrot.slane %v3746_v43, 5  ;;  %v3752_v52 = vrot.slane %v3750_v48, 4  ;;  %v6625_v6 = vld [vmem:[%s6739_s27 + $0x94] sm:$0xf] }
  0xd4   : > { %v7666_v9 = vld [vmem:[%s6739_s27 + $0x64] sm:$0xf]  ;;  %v3761_v61 = vshrl.u32 %v5502_v31, 16  ;;  %v7668_v22 = vrot.slane %v3695_v53, 4  ;;  %v1335_v25 = vrot.slane %v6627_v18, 5  ;;  %v3729_v43 = vor.u32 %v3728_v4, %v7651_v34 }
  0xd5   : > { %6169 = vmatmul.mubr.msk.bf16.gmra.mrb[16].mxu0 %vm685_vm3, %v6570_v10  ;;  %8529 = vst [vmem:[#allocation9_spill] sm:$0xff] %v7666_v9  ;;  %v3764_v10 = vshll.u32 %v5502_v31, 16  ;;  %v3743_v31 = vor.u32 %v3742_v37, %v3739_v27  ;;  %v3753_v53 = vor.u32 %v3752_v52, %v7660_v50  ;;  %v8530_v18 = vcombine.low %v7407_v19, %v7420_v58  ;;  %v6574_v37 = vld [vmem:[%s6739_s27 + $0xb4] sm:$0xff]  }
  0xd6   : > { %6017 = vmatmul.mubr.msk.bf16.vlgmr.msra.gmra.mrb[0].mxu1 %vm685_vm3, %v8527_v38  ;;  %6172 = vmatprep.mubr.msk.bf16.mxu0 %vm685_vm3, %v6571_v21  ;;  %v3718_v21 = vrot.slane %v3716_v15, 5  ;;  %v7649_v38 = vld [vmem:[%s6739_s27 + $0x50] sm:$0x1]  ;;  %v7658_v15 = vld [vmem:[%s6739_s27 + $0x5c] sm:$0x1]  ;;  %v8531_v27 = vcombine.low %v7425_v2, %v7429_v1  ;;  %v1337_v52 = vrot.slane %v1335_v25, 4 }
  0xd7   : > { %6049 = vmatpush3.bf16.msra.mxu1 %v7396_v49  ;;  %6020 = vmatprep.mubr.msk.bf16.mxu1 %vm685_vm3, %v8528_v23  ;;  %v3705_v49 = vor.u32 %v3704_v46, %v7608_v28  ;;  %v7662_v46 = vrot.slane %v3708_v5, 5  ;;  %v1328_v23 = vrot.slane %v6625_v6, 5  ;;  %v3732_v48 = vshll.u32 %v7649_v38, 16  ;;  %v1204_v5 = vld [vmem:[%s6739_s27 + $0x9c] sm:$0xe] }
  0xd8   : > { %6515 = vmatprep.subr.msk.bf16.mxu1 %vm734_vm0, %v6624_v36  ;;  %v6626_v36 = vld [vmem:[%s6739_s27 + $0x98] sm:$0x1]  ;;  %v3719_v7 = vor.u32 %v3718_v21, %v3715_v62  ;;  %v3756_v6 = vshll.u32 %v7658_v15, 16  ;;  %v3774_v62 = vshrl.u32 %v7666_v9, 16  ;;  %v3766_v4 = vrot.slane %v3764_v10, 5 }
  0xd9   : > { %v1331_v33 = vrot.slane %v6626_v36, 5  ;;  %v3706_v8 = vrot.slane %v3705_v49, 4  ;;  %v3770_v36 = vshll.u32 %v7666_v9, 16  ;;  %v7687_v21 = vsel %vm6991_vm7, %v5171_v54, %v1328_v23  ;;  %v7698_v2 = vld [vmem:[%s6739_s27 + $0x68] sm:$0x1] }
  0xda   : > { %v3763_v49 = vrot.slane %v3761_v61, 4  ;;  %v3720_v19 = vrot.slane %v3719_v7, 4  ;;  %v5172_v58 = vrot.slane %v1204_v5, 9  ;;  %v3730_v3 = vrot.slane %v3729_v43, 4  ;;  %8532 = vst [vmem:[#allocation10_spill] sm:$0xff] %v7698_v2  ;;  %v6575_v5 = vld [vmem:[%s6739_s27 + $0xc0] sm:$0xff]  }
  0xdb   : > { %v3734_v54 = vrot.slane %v3732_v48, 5  ;;  %v3758_v63 = vrot.slane %v3756_v6, 5  ;;  %v1342_v61 = vrot.slane %v7133_v56, 5  ;;  %v3744_v10 = vrot.slane %v3743_v31, 4  ;;  %v1206_v31 = vld [vmem:[%s6739_s27 + $0xb4] sm:$0xe] }
  0xdc   : > { %v3754_v51 = vrot.slane %v3753_v53, 4  ;;  %v7700_v1 = vrot.slane %v3770_v36, 5  ;;  %v3776_v7 = vrot.slane %v3774_v62, 4  ;;  %v3701_v43 = vsel %vm6765_vm4, %v7668_v22, %v7608_v28  ;;  %v6629_v62 = vld [vmem:[%s6739_s27 + $0xb0] sm:$0x1] }
  0xdd   : > { %6173 = vmatmul.mubr.msk.bf16.gmra.mrb[20].mxu0 %vm685_vm3, %v6572_v26  ;;  %v1330_v26 = vrot.slane %v1328_v23, 4  ;;  %v1205_v23 = vld [vmem:[%s6739_s27 + $0xa8] sm:$0xe]  ;;  %v3711_v48 = vsel %vm6765_vm4, %v3706_v8, %v7662_v46  ;;  %v3767_v6 = vor.u32 %v3766_v4, %v3763_v49  ;;  %v3725_v53 = vsel %vm6765_vm4, %v3720_v19, %v7651_v34  ;;  %v5505_v46 = vld [vmem:[%s6739_s27 + $0x6c] sm:$0xf] }
  0xde   : > { %6021 = vmatmul.mubr.msk.bf16.gmra.mrb[4].mxu1 %vm685_vm3, %v8530_v18  ;;  %6176 = vmatprep.mubr.msk.bf16.mxu0 %vm685_vm3, %v6573_v30  ;;  %v6628_v18 = vld [vmem:[%s6739_s27 + $0xa4] sm:$0x1]  ;;  %v7720_v36 = vsel %vm6991_vm7, %v5172_v58, %v1335_v25  ;;  %v5173_v28 = vrot.slane %v1205_v23, 9  ;;  %v1344_v8 = vrot.slane %v1342_v61, 4  ;;  %v3780_v49 = vshll.u32 %v7698_v2, 16 }
  0xdf   : > { %6024 = vmatprep.mubr.msk.bf16.mxu1 %vm685_vm3, %v8531_v27  ;;  %v1338_v30 = vrot.slane %v6628_v18, 5  ;;  %v7712_v56 = vsel %vm6991_vm7, %v1330_v26, %v1331_v33  ;;  %v3735_v33 = vsel %vm6765_vm4, %v3730_v3, %v3734_v54  ;;  %v1345_v26 = vrot.slane %v6629_v62, 5  ;;  %v5508_v18 = vld [vmem:[%s6739_s27 + $0x78] sm:$0xf]  ;;  %v7775_v54 = vld [vmem:[%s6739_s27 + $0xbc] sm:$0x1] }
  0xe0   : > { %v3749_v34 = vsel %vm6765_vm4, %v3744_v10, %v7660_v50  ;;  %v3759_v25 = vsel %vm6765_vm4, %v3754_v51, %v3758_v63  ;;  %v3777_v4 = vor.u32 %v3776_v7, %v7700_v1  ;;  %v5174_v27 = vrot.slane %v1206_v31, 9  ;;  %v7749_v51 = vld [vmem:[%s6739_s27 + $0x70] sm:$0xf]  ;;  %v7779_v10 = vld [vmem:[%s6739_s27 + $0x7c] sm:$0xf] }
  0xe1   : > { %v7724_v22 = vsel %vm6991_vm7, %v1337_v52, %v1338_v30  ;;  %v8534_v3 = vcombine.low %v7442_v45, %v7446_v59  ;;  %v7745_v19 = vrot.slane %v3767_v6, 4  ;;  %v1349_v50 = vrot.slane %v7157_v42, 5  ;;  %8535 = vst [vmem:[#allocation12_spill] sm:$0xff] %v7749_v51  ;;  %8537 = vst [vmem:[#allocation13_spill] sm:$0xff] %v7779_v10  ;;  %v5511_v7 = vld [vmem:[%s6739_s27 + $0x84] sm:$0xf] }
  0xe2   : > { %8533 = vst [vmem:[#allocation11_spill] sm:$0xff] %v7724_v22  ;;  %v3785_v63 = vshrl.u32 %v5505_v46, 16  ;;  %v8536_v45 = vcombine.low %v7450_v47, %v7477_v41  ;;  %v7757_v58 = vcombine.low %v3725_v53, %v3735_v33  ;;  %v7763_v42 = vsel %vm6991_vm7, %v5173_v28, %v1342_v61  ;;  %v6576_v61 = vld [vmem:[%s6739_s27 + $0xcc] sm:$0xff]   ;;  %v7791_v31 = vld [vmem:[%s6739_s27 + $0x88] sm:$0xf] }
  0xe3   : > { %v7766_v30 = vcombine.low %v3749_v34, %v3759_v25  ;;  %v7770_v47 = vsel %vm6991_vm7, %v1344_v8, %v1345_v26  ;;  %v7772_v41 = vrot.slane %v3780_v49, 5  ;;  %v3794_v6 = vshll.u32 %v7749_v51, 16  ;;  %8538 = vst [vmem:[#allocation14_spill] sm:$0xff] %v7791_v31  ;;  %v5514_v62 = vld [vmem:[%s6739_s27 + $0x90] sm:$0xf] }
  0xe4   : > { %v7797_v28 = vrot.slane %v1349_v50, 4  ;;  %v7799_v33 = vrot.slane %v3785_v63, 4  ;;  %v3798_v8 = vshrl.u32 %v7749_v51, 16  ;;  %v3809_v26 = vshrl.u32 %v5508_v18, 16  ;;  %v7806_v25 = vld [vmem:[%s6739_s27 + $0x94] sm:$0xf] }
  0xe5   : > { %6177 = vmatmul.mubr.msk.bf16.gmra.mrb[24].mxu0 %vm685_vm3, %v6574_v37  ;;  %v7743_v37 = vcombine.low %v3701_v43, %v3711_v48  ;;  %v7787_v43 = vsel %vm6991_vm7, %v5174_v27, %v1349_v50  ;;  %v3788_v48 = vshll.u32 %v5505_v46, 16  ;;  %v3812_v49 = vshll.u32 %v5508_v18, 16  ;;  %8539 = vst [vmem:[#allocation15_spill] sm:$0xff] %v7806_v25  ;;  %v7844_v2 = vld [vmem:[%s6739_s27 + $0x8c] sm:$0x1] }
  0xe6   : > { %6025 = vmatmul.mubr.msk.bf16.gmra.mrb[8].mxu1 %vm685_vm3, %v8534_v3  ;;  %6180 = vmatprep.mubr.msk.bf16.mxu0 %vm685_vm3, %v6575_v5  ;;  %v7783_v5 = vrot.slane %v3777_v4, 4  ;;  %v3818_v46 = vshll.u32 %v7779_v10, 16  ;;  %v3822_v34 = vshrl.u32 %v7779_v10, 16  ;;  %v3833_v4 = vshrl.u32 %v5511_v7, 16 }
  0xe7   : > { %6028 = vmatprep.mubr.msk.bf16.mxu1 %vm685_vm3, %v8536_v45  ;;  %v3836_v27 = vshll.u32 %v5511_v7, 16  ;;  %v3842_v3 = vshll.u32 %v7791_v31, 16  ;;  %v3846_v50 = vshrl.u32 %v7791_v31, 16  ;;  %v7816_v45 = vld [vmem:[%s6739_s27 + $0x74] sm:$0x1]  ;;  %v3790_v18 = vrot.slane %v3788_v48, 5 }
  0xe8   : > { %v3857_v52 = vshrl.u32 %v5514_v62, 16  ;;  %v3860_v53 = vshll.u32 %v5514_v62, 16  ;;  %v8540_v7 = vcombine.low %v7461_v60, %v7486_v44  ;;  %v3800_v59 = vrot.slane %v3798_v8, 4  ;;  %v5517_v48 = vld [vmem:[%s6739_s27 + $0x9c] sm:$0xf] }
  0xe9   : > { %v3866_v63 = vshll.u32 %v7806_v25, 16  ;;  %v3870_v23 = vshrl.u32 %v7806_v25, 16  ;;  %v8541_v62 = vcombine.low %v7501_v17, %v7505_v57  ;;  %v7834_v44 = vld [vmem:[%s6739_s27 + $0x80] sm:$0x1]  ;;  %v3811_v60 = vrot.slane %v3809_v26, 4 }
  0xea   : > { %8542 = vst [vmem:[#allocation16_spill] sm:$0xff] %v7834_v44  ;;  %v3835_v31 = vrot.slane %v3833_v4, 4  ;;  %v3838_v8 = vrot.slane %v3836_v27, 5  ;;  %v7838_v10 = vrot.slane %v3842_v3, 5  ;;  %v3848_v51 = vrot.slane %v3846_v50, 4 }
  0xeb   : > { %v7841_v25 = vld [vmem:[%s6739_s27 + $0xa0] sm:$0xf]  ;;  %v3859_v17 = vrot.slane %v3857_v52, 4  ;;  %v3862_v57 = vrot.slane %v3860_v53, 5  ;;  %v3884_v9 = vshll.u32 %v5517_v48, 16  ;;  %v3791_v26 = vor.u32 %v3790_v18, %v7799_v33 }
  0xec   : > { %v3828_v27 = vshll.u32 %v7834_v44, 16  ;;  %v7853_v3 = vld [vmem:[%s6739_s27 + $0x98] sm:$0x1]  ;;  %v3890_v50 = vshll.u32 %v7841_v25, 16  ;;  %v3894_v52 = vshrl.u32 %v7841_v25, 16  ;;  %v3839_v22 = vor.u32 %v3838_v8, %v3835_v31 }
  0xed   : > { %6181 = vmatmul.mubr.msk.bf16.gmra.mrb[28].mxu0 %vm685_vm3, %v6576_v61  ;;  %v7824_v61 = vrot.slane %v3794_v6, 5  ;;  %v3824_v6 = vrot.slane %v3822_v34, 4  ;;  %v3872_v34 = vrot.slane %v3870_v23, 4  ;;  %v3852_v33 = vshll.u32 %v7844_v2, 16 }
  0xee   : > { %6029 = vmatmul.mubr.msk.bf16.gmra.mrb[12].mxu1 %vm685_vm3, %v8540_v7  ;;  %6186 = vmatprep.mubr.msk.bf16.mxu0 %vm685_vm3, %v7566_v20  ;;  %v3814_v7 = vrot.slane %v3812_v49, 5  ;;  %v7836_v20 = vrot.slane %v3818_v46, 5  ;;  %v3804_v49 = vshll.u32 %v7816_v45, 16  ;;  %v7848_v46 = vrot.slane %v3866_v63, 5 }
  0xef   : > { %6032 = vmatprep.mubr.msk.bf16.mxu1 %vm685_vm3, %v8541_v62  ;;  %v3881_v62 = vshrl.u32 %v5517_v48, 16  ;;  %v3801_v4 = vor.u32 %v3800_v59, %v7824_v61  ;;  %v3849_v23 = vor.u32 %v3848_v51, %v7838_v10  ;;  %v3863_v59 = vor.u32 %v3862_v57, %v3859_v17  ;;  %v7886_v57 = vld [vmem:[%s6739_s27 + $0xa4] sm:$0x1] }
  0xf0   : > { %v3815_v53 = vor.u32 %v3814_v7, %v3811_v60  ;;  %v3825_v48 = vor.u32 %v3824_v6, %v7836_v20  ;;  %v3886_v18 = vrot.slane %v3884_v9, 5  ;;  %v8543_v44 = vcombine.low %v7513_v11, %v7517_v40 }
  0xf1   : > { %v3883_v63 = vrot.slane %v3881_v62, 4  ;;  %v8544_v31 = vrot.slane %v7775_v54, 5  ;;  %v3806_v51 = vrot.slane %v3804_v49, 5  ;;  %v3873_v60 = vor.u32 %v3872_v34, %v7848_v46  ;;  %v7889_v34 = vld [vmem:[%s6739_s27 + $0xac] sm:$0xf] }
  0xf2   : > { %v3876_v9 = vshll.u32 %v7853_v3, 16  ;;  %v8545_v11 = vcombine.low %v7585_v39, %v7589_v55  ;;  %v3792_v40 = vrot.slane %v3791_v26, 4  ;;  %v7882_v54 = vrot.slane %v3890_v50, 5 }
  0xf3   : > { %v3816_v7 = vrot.slane %v3815_v53, 4  ;;  %v3826_v6 = vrot.slane %v3825_v48, 4  ;;  %v3830_v8 = vrot.slane %v3828_v27, 5  ;;  %v3854_v17 = vrot.slane %v3852_v33, 5  ;;  %v7899_v48 = vld [vmem:[%s6739_s27 + $0xb0] sm:$0x1] }
  0xf4   : > { %v3840_v39 = vrot.slane %v3839_v22, 4  ;;  %v3850_v55 = vrot.slane %v3849_v23, 4  ;;  %v3864_v62 = vrot.slane %v3863_v59, 4  ;;  %v3887_v49 = vor.u32 %v3886_v18, %v3883_v63 }
  0xf5   : > { %6187 = vmatmul.mubr.msk.bf16.vlgmr.msra.gmra.mrb[0].mxu0 %vm685_vm3, %v7629_v16  ;;  %v7872_v16 = vsel %vm6991_vm7, %v7797_v28, %v8544_v31  ;;  %v3896_v28 = vrot.slane %v3894_v52, 4  ;;  %v3878_v26 = vrot.slane %v3876_v9, 5  ;;  %v3797_v52 = vsel %vm6765_vm4, %v3792_v40, %v7824_v61 }
  0xf6   : > { %6033 = vmatmul.mubr.msk.bf16.gmra.mrb[16].mxu1 %vm685_vm3, %v8543_v44  ;;  %6219 = vmatpush3.bf16.msra.mxu0 %v7570_v14  ;;  %v3802_v14 = vrot.slane %v3801_v4, 4  ;;  %v5520_v44 = vld [vmem:[%s6739_s27 + $0xa8] sm:$0xf]  ;;  %v3900_v22 = vshll.u32 %v7886_v57, 16  ;;  %v3821_v33 = vsel %vm6765_vm4, %v3816_v7, %v7836_v20  ;;  %v3831_v23 = vsel %vm6765_vm4, %v3826_v6, %v3830_v8 }
  0xf7   : > { %6036 = vmatprep.mubr.msk.bf16.mxu1 %vm685_vm3, %v8545_v11  ;;  %6190 = vmatprep.mubr.msk.bf16.mxu0 %vm685_vm3, %v7640_v29  ;;  %v3874_v29 = vrot.slane %v3873_v60, 4  ;;  %v3905_v4 = vshrl.u32 %v5520_v44, 16  ;;  %v3908_v50 = vshll.u32 %v5520_v44, 16  ;;  %v3897_v53 = vor.u32 %v3896_v28, %v7882_v54  ;;  %v5569_v11 = vld [vmem:[%s6739_s27 + $0x48] sm:$0xe] }
  0xf8   : > { %v3807_v27 = vsel %vm6765_vm4, %v3802_v14, %v3806_v51  ;;  %v3914_v59 = vshll.u32 %v7889_v34, 16  ;;  %v3918_v61 = vshrl.u32 %v7889_v34, 16  ;;  %v3845_v63 = vsel %vm6765_vm4, %v3840_v39, %v7838_v10  ;;  %v7964_v39 = vld [vmem:[%s6739_s27 + $0xb8] sm:$0xf] }
  0xf9   : > { %v3855_v18 = vsel %vm6765_vm4, %v3850_v55, %v3854_v17  ;;  %v3869_v20 = vsel %vm6765_vm4, %v3864_v62, %v7848_v46  ;;  %v3888_v31 = vrot.slane %v3887_v49, 4  ;;  %v8546_v51 = vcombine.low %v7602_v12, %v7617_v35 }
  0xfa   : > { %v3907_v10 = vrot.slane %v3905_v4, 4  ;;  %v3910_v60 = vrot.slane %v3908_v50, 5  ;;  %v3924_v9 = vshll.u32 %v7899_v48, 16  ;;  %v8547_v46 = vcombine.low %v7687_v21, %v7712_v56  ;;  %v5523_v21 = vld [vmem:[%s6739_s27 + $0xb4] sm:$0xf] }
  0xfb   : > { %v5190_v12 = vcombine.low %v7763_v42, %v7770_v47  ;;  %v8548_v35 = vsel %vm6765_vm4, %v7783_v5, %v7772_v41  ;;  %v3898_v14 = vrot.slane %v3897_v53, 4  ;;  %v3902_v28 = vrot.slane %v3900_v22, 5  ;;  %v5571_v4 = vld [vmem:[%s6739_s27 + $0x60] sm:$0xe]  ;;  %v5572_v53 = vld [vmem:[%s6739_s27 + $0x6c] sm:$0xe] }
  0xfc   : > { %v5191_v56 = vcombine.low %v7787_v43, %v7872_v16  ;;  %v7947_v44 = vcombine.low %v3797_v52, %v3807_v27  ;;  %v7949_v42 = vrot.slane %v3914_v59, 5  ;;  %v3920_v47 = vrot.slane %v3918_v61, 4  ;;  %v8557_v16 = vld [vmem:[#allocation4_spill] sm:$0xff] }
  0xfd   : > { %6191 = vmatmul.mubr.msk.bf16.gmra.mrb[4].mxu0 %vm685_vm3, %v7743_v37  ;;  %v3879_v37 = vsel %vm6765_vm4, %v3874_v29, %v3878_v26  ;;  %v7951_v41 = vcombine.low %v3821_v33, %v3831_v23  ;;  %v7953_v5 = vcombine.low %v3845_v63, %v3855_v18  ;;  %v3893_v6 = vsel %vm6765_vm4, %v3888_v31, %v7882_v54  ;;  %v8550_v23 = vld [vmem:[#allocation11_spill] sm:$0xff]  ;;  %v5526_v63 = vld [vmem:[%s6739_s27 + $0xc0] sm:$0xf]  ;;  %v8552_v18 = vld [vmem:[#allocation9_spill] sm:$0xff] }
  0xfe   : > { %6037 = vmatmul.mubr.msk.bf16.gmra.mrb[20].mxu1 %vm685_vm3, %v8546_v51  ;;  %6194 = vmatprep.mubr.msk.bf16.mxu0 %vm685_vm3, %v7757_v58  ;;  %v8549_v58 = vsel %vm6765_vm4, %v7745_v19, %v7700_v1  ;;  %v7955_v7 = vcombine.low %v3869_v20, %v3879_v37  ;;  %v5585_v1 = vrot.slane %v5569_v11, 9  ;;  %v5570_v19 = vld [vmem:[%s6739_s27 + $0x54] sm:$0xe]  ;;  %v3911_v8 = vor.u32 %v3910_v60, %v3907_v10  ;;  %v8553_v31 = vld [vmem:[#allocation10_spill] sm:$0xff] }
  0xff   : > { %6040 = vmatprep.mubr.msk.bf16.mxu1 %vm685_vm3, %v8547_v46  ;;  %v5539_v40 = vcombine.low %v8549_v58, %v8548_v35  ;;  %v7961_v17 = vrot.slane %v3924_v9, 5  ;;  %v3929_v55 = vshrl.u32 %v5523_v21, 16  ;;  %v3903_v62 = vsel %vm6765_vm4, %v3898_v14, %v3902_v28  ;;  %v8554_v9 = vld [vmem:[#allocation12_spill] sm:$0xff]  ;;  %v8013_v35 = vld [vmem:[%s6739_s27 + $0xbc] sm:$0x1] }
 0x100   : > { %v3932_v49 = vshll.u32 %v5523_v21, 16  ;;  %v4388_v29 = vrot.slane %v7595_v0, 5  ;;  %v4391_v26 = vrot.slane %v7649_v38, 5  ;;  %v3921_v50 = vor.u32 %v3920_v47, %v7949_v42  ;;  %v8016_v58 = vld [vmem:[%s6739_s27 + $0xc4] sm:$0xf] }
 0x101   : > { %v5586_v52 = vrot.slane %v5570_v19, 9  ;;  %v4395_v54 = vrot.slane %v7606_v24, 5  ;;  %v4398_v27 = vrot.slane %v7658_v15, 5  ;;  %v3938_v22 = vshll.u32 %v7964_v39, 16  ;;  %v5573_v19 = vld [vmem:[%s6739_s27 + $0x78] sm:$0xe] }
 0x102   : > { %v3942_v33 = vshrl.u32 %v7964_v39, 16  ;;  %v7981_v0 = vsel %vm6991_vm7, %v5585_v1, %v4388_v29  ;;  %v4390_v38 = vrot.slane %v4388_v29, 4  ;;  %v8551_v59 = vcombine.low %v7720_v36, %v8550_v23  ;;  %v8555_v23 = vld [vmem:[#allocation13_spill] sm:$0xff] }
 0x103   : > { %v7988_v24 = vcombine.low %v3893_v6, %v3903_v62  ;;  %v7992_v15 = vsel %vm6991_vm7, %v5586_v52, %v4395_v54  ;;  %v5587_v61 = vrot.slane %v5571_v4, 9  ;;  %v4402_v20 = vrot.slane %v8552_v18, 5  ;;  %v6577_v6 = vld [vmem:[%s6739_s27 + $0xc] sm:$0xff]  }
 0x104   : > { %v7998_v36 = vsel %vm6991_vm7, %v4390_v38, %v4391_v26  ;;  %v4405_v51 = vrot.slane %v8553_v31, 5  ;;  %v5588_v37 = vrot.slane %v5572_v53, 9  ;;  %v4409_v11 = vrot.slane %v8554_v9, 5 }
 0x105   : > { %6195 = vmatmul.mubr.msk.bf16.gmra.mrb[8].mxu0 %vm685_vm3, %v7766_v30  ;;  %v4397_v30 = vrot.slane %v4395_v54, 4  ;;  %v5602_v10 = vcombine.low %v7981_v0, %v7998_v36  ;;  %v4412_v46 = vrot.slane %v7816_v45, 5  ;;  %v8022_v14 = vsel %vm6991_vm7, %v5587_v61, %v4402_v20 }
 0x106   : > { %6041 = vmatmul.mubr.msk.bf16.gmra.mrb[24].mxu1 %vm685_vm3, %v8551_v59  ;;  %6198 = vmatprep.mubr.msk.bf16.mxu0 %vm685_vm3, %v5539_v40  ;;  %v4404_v28 = vrot.slane %v4402_v20, 4  ;;  %v8024_v21 = vrot.slane %v3929_v55, 4  ;;  %v3953_v47 = vshrl.u32 %v5526_v63, 16  ;;  %v8028_v45 = vsel %vm6991_vm7, %v5588_v37, %v4409_v11  ;;  %v5300_v55 = vld [vmem:[%s6739_s27 + $0x78] sm:$0xf]  ;;  %v8556_v59 = vld [vmem:[#allocation16_spill] sm:$0xff] }
 0x107   : > { %6044 = vmatprep.mubr.msk.bf16.mxu1 %vm685_vm3, %v5190_v12  ;;  %v8006_v60 = vsel %vm6991_vm7, %v4397_v30, %v4398_v27  ;;  %v8010_v12 = vrot.slane %v3911_v8, 4  ;;  %v4411_v1 = vrot.slane %v4409_v11, 4  ;;  %v8032_v8 = vrot.slane %v3921_v50, 4 }
 0x108   : > { %v5603_v40 = vcombine.low %v7992_v15, %v8006_v60  ;;  %v8034_v62 = vrot.slane %v3932_v49, 5  ;;  %v3956_v29 = vshll.u32 %v5526_v63, 16  ;;  %v8038_v26 = vsel %vm6991_vm7, %v4404_v28, %v4405_v51  ;;  %v8559_v28 = vld [vmem:[#allocation14_spill] sm:$0xff] }
 0x109   : > { %v8041_v4 = vrot.slane %v3938_v22, 5  ;;  %v8043_v52 = vrot.slane %v3942_v33, 4  ;;  %v5604_v54 = vcombine.low %v8022_v14, %v8038_v26  ;;  %v8049_v27 = vsel %vm6991_vm7, %v4411_v1, %v4412_v46  ;;  %v5574_v33 = vld [vmem:[%s6739_s27 + $0x84] sm:$0xe]  ;;  %v6578_v1 = vld [vmem:[%s6739_s27 + $0x18] sm:$0xff]  }
 0x10a   : > { %v3948_v49 = vshll.u32 %v8013_v35, 16  ;;  %v3962_v50 = vshll.u32 %v8016_v58, 16  ;;  %v5605_v53 = vcombine.low %v8028_v45, %v8049_v27  ;;  %v5589_v22 = vrot.slane %v5573_v19, 9  ;;  %v6640_v60 = vld [vmem:[%s6739_s27 + $0xa0] sm:$0xf] }
 0x10b   : > { %v3955_v38 = vrot.slane %v3953_v47, 4  ;;  %v4419_v30 = vrot.slane %v8556_v59, 5  ;;  %v2275_v61 = vshrl.u32 %v5300_v55, 16  ;;  %v3958_v63 = vrot.slane %v3956_v29, 5  ;;  %v5529_v29 = vld [vmem:[%s6739_s27 + $0xcc] sm:$0xf] }
 0x10c   : > { %v3966_v18 = vshrl.u32 %v8016_v58, 16  ;;  %v2278_v43 = vshll.u32 %v5300_v55, 16  ;;  %v5590_v37 = vrot.slane %v5574_v33, 9  ;;  %v3917_v9 = vsel %vm6765_vm4, %v8010_v12, %v7949_v42  ;;  %v8092_v55 = vld [vmem:[%s6739_s27 + $0xd0] sm:$0xf] }
 0x10d   : > { %6199 = vmatmul.mubr.msk.bf16.gmra.mrb[12].mxu0 %vm685_vm3, %v7947_v44  ;;  %v4416_v44 = vrot.slane %v8555_v23, 5  ;;  %v2277_v51 = vrot.slane %v2275_v61, 4  ;;  %v3935_v11 = vor.u32 %v8034_v62, %v8024_v21  ;;  %v4423_v47 = vrot.slane %v8559_v28, 5  ;;  %v6579_v21 = vld [vmem:[%s6739_s27 + $0x24] sm:$0xff]   ;;  %v6644_v27 = vld [vmem:[%s6739_s27 + $0xac] sm:$0xf] }
 0x10e   : > { %6045 = vmatmul.mubr.msk.bf16.gmra.mrb[28].mxu1 %vm685_vm3, %v5191_v56  ;;  %6202 = vmatprep.mubr.msk.bf16.mxu0 %vm685_vm3, %v7951_v41  ;;  %v8558_v56 = vld [vmem:[#allocation5_spill] sm:$0xff]  ;;  %v2280_v46 = vrot.slane %v2278_v43, 5  ;;  %v3927_v19 = vsel %vm6765_vm4, %v8032_v8, %v7961_v17  ;;  %v4426_v12 = vrot.slane %v7844_v2, 5  ;;  %v8100_v62 = vrot.slane %v3962_v50, 5  ;;  %v5575_v8 = vld [vmem:[%s6739_s27 + $0x90] sm:$0xe] }
 0x10f   : > { %6050 = vmatprep.mubr.msk.bf16.mxu1 %vm685_vm3, %v6577_v6  ;;  %v2297_v41 = vsel %vm6765_vm4, %v8558_v56, %v8557_v16  ;;  %v8074_v20 = vsel %vm6991_vm7, %v5589_v22, %v4416_v44  ;;  %v4418_v31 = vrot.slane %v4416_v44, 4  ;;  %v3945_v6 = vor.u32 %v8043_v52, %v8041_v4  ;;  %v8106_v52 = vld [vmem:[%s6739_s27 + $0xc8] sm:$0x1]  ;;  %v8561_v16 = vld [vmem:[#allocation2_spill] sm:$0xff] }
 0x110   : > { %v3968_v22 = vrot.slane %v3966_v18, 4  ;;  %v2281_v17 = vor.u32 %v2280_v46, %v2277_v51  ;;  %v3950_v23 = vrot.slane %v3948_v49, 5  ;;  %v3959_v44 = vor.u32 %v3958_v63, %v3955_v38  ;;  %v8562_v51 = vld [vmem:[#allocation3_spill] sm:$0xff] }
 0x111   : > { %v8096_v42 = vsel %vm6991_vm7, %v4418_v31, %v4419_v30  ;;  %v8110_v59 = vsel %vm6991_vm7, %v5590_v37, %v4423_v47  ;;  %v4425_v30 = vrot.slane %v4423_v47, 4  ;;  %v3977_v2 = vshrl.u32 %v5529_v29, 16 }
 0x112   : > { %v5606_v33 = vcombine.low %v8074_v20, %v8096_v42  ;;  %v3980_v50 = vshll.u32 %v5529_v29, 16  ;;  %v3986_v61 = vshll.u32 %v8092_v55, 16  ;;  %v2282_v18 = vrot.slane %v2281_v17, 4  ;;  %v6580_v29 = vld [vmem:[%s6739_s27 + $0x30] sm:$0xff]  }
 0x113   : > { %v3990_v49 = vshrl.u32 %v8092_v55, 16  ;;  %v8121_v38 = vsel %vm6991_vm7, %v4425_v30, %v4426_v12  ;;  %v5591_v63 = vrot.slane %v5575_v8, 9  ;;  %v3969_v56 = vor.u32 %v3968_v22, %v8100_v62 }
 0x114   : > { %v3972_v31 = vshll.u32 %v8106_v52, 16  ;;  %v5607_v37 = vcombine.low %v8110_v59, %v8121_v38  ;;  %v5545_v46 = vcombine.low %v3917_v9, %v3927_v19  ;;  %v3936_v28 = vrot.slane %v3935_v11, 4  ;;  %v5576_v11 = vld [vmem:[%s6739_s27 + $0x9c] sm:$0xe] }
 0x115   : > { %6203 = vmatmul.mubr.msk.bf16.gmra.mrb[16].mxu0 %vm685_vm3, %v7953_v5  ;;  %v8560_v5 = vld [vmem:[#allocation15_spill] sm:$0xff]  ;;  %v3946_v47 = vrot.slane %v3945_v6, 4  ;;  %v3960_v12 = vrot.slane %v3959_v44, 4  ;;  %v4433_v8 = vrot.slane %v7853_v3, 5  ;;  %v3979_v30 = vrot.slane %v3977_v2, 4  ;;  %v6581_v19 = vld [vmem:[%s6739_s27 + $0x3c] sm:$0xff]  }
 0x116   : > { %6051 = vmatmul.mubr.msk.bf16.vlgmr.msra.gmra.mrb[0].mxu1 %vm685_vm3, %v6578_v1  ;;  %6206 = vmatprep.mubr.msk.bf16.mxu0 %vm685_vm3, %v7955_v7  ;;  %v4430_v43 = vrot.slane %v8560_v5, 5  ;;  %v2287_v7 = vsel %vm6765_vm4, %v2282_v18, %v8562_v51  ;;  %v3982_v18 = vrot.slane %v3980_v50, 5  ;;  %v8144_v5 = vrot.slane %v3986_v61, 5 }
 0x117   : > { %6253 = vmatpush3.bf16.msra.mxu1 %v8561_v16  ;;  %6054 = vmatprep.mubr.msk.bf16.mxu1 %vm685_vm3, %v6579_v21  ;;  %v8133_v1 = vcombine.low %v2287_v7, %v2297_v41  ;;  %v8137_v21 = vld [vmem:[%s6739_s27 + $0xd4] sm:$0x1]  ;;  %v3992_v9 = vrot.slane %v3990_v49, 4  ;;  %v3970_v41 = vrot.slane %v3969_v56, 4  ;;  %v3974_v6 = vrot.slane %v3972_v31, 5 }
 0x118   : > { %v8141_v22 = vsel %vm6991_vm7, %v5591_v63, %v4430_v43  ;;  %v4432_v17 = vrot.slane %v4430_v43, 4  ;;  %v3941_v63 = vsel %vm6765_vm4, %v3936_v28, %v8041_v4  ;;  %v3951_v2 = vsel %vm6765_vm4, %v3946_v47, %v3950_v23  ;;  %v6631_v16 = vld [vmem:[%s6739_s27 + $0x1c] sm:$0xf]  ;;  %v5577_v28 = vld [vmem:[%s6739_s27 + $0xa8] sm:$0xe] }
 0x119   : > { %v3996_v50 = vshll.u32 %v8137_v21, 16  ;;  %v5592_v61 = vrot.slane %v5576_v11, 9  ;;  %v4437_v49 = vrot.slane %v7841_v25, 5  ;;  %v3965_v4 = vsel %vm6765_vm4, %v3960_v12, %v8100_v62  ;;  %v5565_v62 = vld [vmem:[%s6739_s27 + $0x18] sm:$0xe]  ;;  %v6582_v47 = vld [vmem:[%s6739_s27 + $0x48] sm:$0xff]  }
 0x11a   : > { %v8150_v44 = vsel %vm6991_vm7, %v4432_v17, %v4433_v8  ;;  %v3993_v43 = vor.u32 %v3992_v9, %v8144_v5  ;;  %v4440_v23 = vrot.slane %v7886_v57, 5  ;;  %v3975_v25 = vsel %vm6765_vm4, %v3970_v41, %v3974_v6  ;;  %v6632_v11 = vld [vmem:[%s6739_s27 + $0x20] sm:$0x1] }
 0x11b   : > { %v5608_v3 = vcombine.low %v8141_v22, %v8150_v44  ;;  %v4360_v56 = vrot.slane %v6631_v16, 5  ;;  %v8176_v31 = vsel %vm6991_vm7, %v5592_v61, %v4437_v49  ;;  %v4439_v51 = vrot.slane %v4437_v49, 4  ;;  %v5578_v49 = vld [vmem:[%s6739_s27 + $0xb4] sm:$0xe] }
 0x11c   : > { %v5546_v7 = vcombine.low %v3941_v63, %v3951_v2  ;;  %v3994_v17 = vrot.slane %v3993_v43, 4  ;;  %v5593_v41 = vrot.slane %v5577_v28, 9  ;;  %v4444_v6 = vrot.slane %v7889_v34, 5  ;;  %v5566_v2 = vld [vmem:[%s6739_s27 + $0x24] sm:$0xe] }
 0x11d   : > { %6207 = vmatmul.mubr.msk.bf16.gmra.mrb[20].mxu0 %vm685_vm3, %v7988_v24  ;;  %v3983_v24 = vor.u32 %v3982_v18, %v3979_v30  ;;  %v8181_v57 = vsel %vm6991_vm7, %v4439_v51, %v4440_v23  ;;  %v6583_v30 = vld [vmem:[%s6739_s27 + $0x54] sm:$0xff]   ;;  %v5581_v18 = vrot.slane %v5565_v62, 9  ;;  %v4362_v9 = vrot.slane %v4360_v56, 4  ;;  %v6635_v28 = vld [vmem:[%s6739_s27 + $0x2c] sm:$0x1] }
 0x11e   : > { %6055 = vmatmul.mubr.msk.bf16.gmra.mrb[4].mxu1 %vm685_vm3, %v6580_v29  ;;  %6210 = vmatprep.mubr.msk.bf16.mxu0 %vm685_vm3, %v5545_v46  ;;  %v3998_v46 = vrot.slane %v3996_v50, 5  ;;  %v5547_v29 = vcombine.low %v3965_v4, %v3975_v25  ;;  %v5609_v8 = vcombine.low %v8176_v31, %v8181_v57  ;;  %v4447_v63 = vrot.slane %v7899_v48, 5  ;;  %v6633_v50 = vld [vmem:[%s6739_s27 + $0x28] sm:$0xf]  ;;  %v5567_v25 = vld [vmem:[%s6739_s27 + $0x30] sm:$0xe] }
 0x11f   : > { %6058 = vmatprep.mubr.msk.bf16.mxu1 %vm685_vm3, %v6581_v19  ;;  %v3984_v12 = vrot.slane %v3983_v24, 4  ;;  %v4363_v19 = vrot.slane %v6632_v11, 5  ;;  %v4367_v61 = vrot.slane %v6633_v50, 5  ;;  %v8204_v48 = vsel %vm6991_vm7, %v5593_v41, %v4444_v6  ;;  %v6585_v11 = vld [vmem:[%s6739_s27 + $0x6c] sm:$0xff]   ;;  %v8563_v41 = vld [vmem:[#allocation6_spill] sm:$0xff] }
 0x120   : > { %v3999_v34 = vsel %vm6765_vm4, %v3994_v17, %v3998_v46  ;;  %v4446_v24 = vrot.slane %v4444_v6, 4  ;;  %v4361_v43 = vsel %vm6991_vm7, %v5581_v18, %v4360_v56  ;;  %v5582_v51 = vrot.slane %v5566_v2, 9  ;;  %v5579_v50 = vld [vmem:[%s6739_s27 + $0xc0] sm:$0xe]  ;;  %v6649_v31 = vld [vmem:[%s6739_s27 + $0xc8] sm:$0x1] }
 0x121   : > { %v3989_v4 = vsel %vm6765_vm4, %v3984_v12, %v8144_v5  ;;  %v4364_v23 = vsel %vm6991_vm7, %v4362_v9, %v4363_v19  ;;  %v6634_v5 = vld [vmem:[%s6739_s27 + $0x34] sm:$0xf]  ;;  %v6584_v12 = vld [vmem:[%s6739_s27 + $0x60] sm:$0xff]   ;;  %v5583_v18 = vrot.slane %v5567_v25, 9  ;;  %v4454_v9 = vrot.slane %v8013_v35, 5 }
 0x122   : > { %v4374_v16 = vrot.slane %v6634_v5, 5  ;;  %v8215_v62 = vsel %vm6991_vm7, %v4446_v24, %v4447_v63  ;;  %v5548_v46 = vcombine.low %v3989_v4, %v3999_v34  ;;  %v5598_v17 = vcombine.low %v4361_v43, %v4364_v23  ;;  %v5568_v24 = vld [vmem:[%s6739_s27 + $0x3c] sm:$0xe] }
 0x123   : > { %v5610_v56 = vcombine.low %v8204_v48, %v8215_v62  ;;  %v4377_v6 = vrot.slane %v8563_v41, 5  ;;  %v4368_v35 = vsel %vm6991_vm7, %v5582_v51, %v4367_v61  ;;  %v5595_v5 = vrot.slane %v5579_v50, 9 }
 0x124   : > { %v4376_v19 = vrot.slane %v4374_v16, 4  ;;  %v4375_v23 = vsel %vm6991_vm7, %v5583_v18, %v4374_v16  ;;  %v4461_v51 = vrot.slane %v8106_v52, 5  ;;  %v2438_v57 = vshll.u32 %v6649_v31, 16 }
 0x125   : > { %6211 = vmatmul.mubr.msk.bf16.gmra.mrb[24].mxu0 %vm685_vm3, %v5546_v7  ;;  %v5594_v7 = vrot.slane %v5578_v49, 9 }
 0x126   : > { %6059 = vmatmul.mubr.msk.bf16.gmra.mrb[8].mxu1 %vm685_vm3, %v6582_v47  ;;  %6214 = vmatprep.mubr.msk.bf16.mxu0 %vm685_vm3, %v5547_v29  ;;  %v4370_v47 = vrot.slane %v6635_v28, 5  ;;  %v4451_v29 = vrot.slane %v7964_v39, 5  ;;  %v8564_v39 = vld [vmem:[#allocation7_spill] sm:$0xff]  ;;  %v4378_v25 = vsel %vm6991_vm7, %v4376_v19, %v4377_v6  ;;  %v5584_v28 = vrot.slane %v5568_v24, 9 }
 0x127   : > { %6062 = vmatprep.mubr.msk.bf16.mxu1 %vm685_vm3, %v6583_v30  ;;  %v4369_v30 = vrot.slane %v4367_v61, 4  ;;  %v4381_v49 = vrot.slane %v8564_v39, 5  ;;  %v4458_v61 = vrot.slane %v8016_v58, 5  ;;  %v6636_v39 = vld [vmem:[%s6739_s27 + $0x70] sm:$0xf]  ;;  %v4465_v24 = vrot.slane %v8092_v55, 5 }
 0x128   : > { %v8227_v63 = vsel %vm6991_vm7, %v5594_v7, %v4451_v29  ;;  %v4453_v2 = vrot.slane %v4451_v29, 4  ;;  %v5297_v7 = vld [vmem:[%s6739_s27 + $0x6c] sm:$0xf]  ;;  %v8565_v29 = vld [vmem:[#allocation8_spill] sm:$0xff] }
 0x129   : > { %v4371_v34 = vsel %vm6991_vm7, %v4369_v30, %v4370_v47  ;;  %v4383_v47 = vrot.slane %v4381_v49, 4  ;;  %v6586_v30 = vld [vmem:[%s6739_s27 + $0x78] sm:$0xff]   ;;  %v8258_v16 = vsel %vm6991_vm7, %v5595_v5, %v4458_v61  ;;  %v4460_v18 = vrot.slane %v4458_v61, 4 }
 0x12a   : > { %v8234_v4 = vsel %vm6991_vm7, %v4453_v2, %v4454_v9  ;;  %v5600_v9 = vcombine.low %v4375_v23, %v4378_v25  ;;  %v2251_v19 = vshrl.u32 %v5297_v7, 16  ;;  %v2254_v41 = vshll.u32 %v5297_v7, 16 }
 0x12b   : > { %v5611_v43 = vcombine.low %v8227_v63, %v8234_v4  ;;  %v8263_v58 = vsel %vm6991_vm7, %v4460_v18, %v4461_v51  ;;  %v4382_v6 = vsel %vm6991_vm7, %v5584_v28, %v4381_v49  ;;  %v4468_v49 = vrot.slane %v8137_v21, 5  ;;  %v6588_v51 = vld [vmem:[%s6739_s27 + $0x90] sm:$0xff]   ;;  %v6589_v21 = vld [vmem:[%s6739_s27 + $0x9c] sm:$0xff]  }
 0x12c   : > { %v5612_v50 = vcombine.low %v8258_v16, %v8263_v58  ;;  %v2253_v23 = vrot.slane %v2251_v19, 4  ;;  %v2256_v25 = vrot.slane %v2254_v41, 5  ;;  %v4467_v7 = vrot.slane %v4465_v24, 4 }
 0x12d   : > { %6215 = vmatmul.mubr.msk.bf16.gmra.mrb[28].mxu0 %vm685_vm3, %v5548_v46  ;;  %v5599_v46 = vcombine.low %v4368_v35, %v4371_v34  ;;  %v2260_v35 = vshll.u32 %v6636_v39, 16  ;;  %v2264_v34 = vshrl.u32 %v6636_v39, 16 }
 0x12e   : > { %6063 = vmatmul.mubr.msk.bf16.gmra.mrb[12].mxu1 %vm685_vm3, %v6584_v12  ;;  %6220 = vmatprep.mubr.msk.bf16.mxu0 %vm685_vm3, %v5598_v17  ;;  %v4384_v12 = vrot.slane %v8565_v29, 5  ;;  %v5580_v17 = vld [vmem:[%s6739_s27 + $0xcc] sm:$0xe]  ;;  %v8285_v55 = vsel %vm6991_vm7, %v4467_v7, %v4468_v49 }
 0x12f   : > { %6066 = vmatprep.mubr.msk.bf16.mxu1 %vm685_vm3, %v6585_v11  ;;  %v6587_v11 = vld [vmem:[%s6739_s27 + $0x84] sm:$0xff]   ;;  %v5596_v52 = vrot.slane %v5580_v17, 9  ;;  %v2266_v28 = vrot.slane %v2264_v34, 4  ;;  %v6637_v17 = vld [vmem:[%s6739_s27 + $0x74] sm:$0x1] }
 0x130   : > { %v4385_v2 = vsel %vm6991_vm7, %v4383_v47, %v4384_v12  ;;  %v5303_v47 = vld [vmem:[%s6739_s27 + $0x84] sm:$0xf]  ;;  %v2257_v12 = vor.u32 %v2256_v25, %v2253_v23  ;;  %v6591_v34 = vld [vmem:[%s6739_s27 + $0xb4] sm:$0xff]  }
 0x131   : > { %v8280_v5 = vsel %vm6991_vm7, %v5596_v52, %v4465_v24  ;;  %v5601_v61 = vcombine.low %v4382_v6, %v4385_v2  ;;  %v2302_v18 = vshll.u32 %v5303_v47, 16  ;;  %v5306_v6 = vld [vmem:[%s6739_s27 + $0x90] sm:$0xf]  ;;  %v6590_v2 = vld [vmem:[%s6739_s27 + $0xa8] sm:$0xff]  }
 0x132   : > { %v5613_v29 = vcombine.low %v8280_v5, %v8285_v55  ;;  %v2258_v52 = vrot.slane %v2257_v12, 4  ;;  %v2323_v23 = vshrl.u32 %v5306_v6, 16  ;;  %v2326_v25 = vshll.u32 %v5306_v6, 16 }
 0x133   : > { %v2356_v12 = vshll.u32 %v6640_v60, 16 }
 0x134   : > { %v2328_v14 = vrot.slane %v2326_v25, 5  ;;  %v6643_v25 = vld [vmem:[%s6739_s27 + $0xa4] sm:$0x1] }
 0x135   : > { %6221 = vmatmul.mubr.msk.bf16.vlgmr.msra.gmra.mrb[0].mxu0 %vm685_vm3, %v5599_v46  ;;  %v2262_v46 = vrot.slane %v2260_v35, 5  ;;  %v5309_v35 = vld [vmem:[%s6739_s27 + $0x9c] sm:$0xf]  ;;  %v8327_v6 = vrot.slane %v2356_v12, 5 }
 0x136   : > { %6067 = vmatmul.mubr.msk.bf16.gmra.mrb[16].mxu1 %vm685_vm3, %v6586_v30  ;;  %6224 = vmatprep.mubr.msk.bf16.mxu0 %vm685_vm3, %v5600_v9  ;;  %v2270_v30 = vshll.u32 %v6637_v17, 16  ;;  %v2299_v9 = vshrl.u32 %v5303_v47, 16  ;;  %v2350_v47 = vshll.u32 %v5309_v35, 16  ;;  %v6641_v17 = vld [vmem:[%s6739_s27 + $0x8c] sm:$0x1] }
 0x137   : > { %6070 = vmatprep.mubr.msk.bf16.mxu1 %vm685_vm3, %v6587_v11  ;;  %v2267_v13 = vor.u32 %v2266_v28, %v2262_v46  ;;  %v6638_v11 = vld [vmem:[%s6739_s27 + $0x88] sm:$0xf]  ;;  %v2263_v7 = vsel %vm6765_vm4, %v2258_v52, %v2262_v46 }
 0x138   : > { %v2308_v19 = vshll.u32 %v6638_v11, 16  ;;  %v2312_v41 = vshrl.u32 %v6638_v11, 16  ;;  %v2272_v0 = vrot.slane %v2270_v30, 5  ;;  %v2301_v36 = vrot.slane %v2299_v9, 4 }
 0x139   : > { %v2268_v39 = vrot.slane %v2267_v13, 4  ;;  %v2318_v30 = vshll.u32 %v6641_v17, 16  ;;  %v2325_v9 = vrot.slane %v2323_v23, 4  ;;  %v2352_v11 = vrot.slane %v2350_v47, 5 }
 0x13a   : > { %v8304_v24 = vrot.slane %v2308_v19, 5  ;;  %v2314_v49 = vrot.slane %v2312_v41, 4  ;;  %v6592_v19 = vld [vmem:[%s6739_s27 + $0xc0] sm:$0xff]  }
 0x13b   : > { %v2273_v46 = vsel %vm6765_vm4, %v2268_v39, %v2272_v0  ;;  %v5312_v39 = vld [vmem:[%s6739_s27 + $0xa8] sm:$0xf] }
 0x13c   : > { %v2315_v13 = vor.u32 %v2314_v49, %v8304_v24  ;;  %v5330_v41 = vcombine.low %v2263_v7, %v2273_v46  ;;  %v2366_v7 = vshll.u32 %v6643_v25, 16  ;;  %v2374_v45 = vshll.u32 %v5312_v39, 16 }
 0x13d   : > { %6225 = vmatmul.mubr.msk.bf16.gmra.mrb[4].mxu0 %vm685_vm3, %v5601_v61  ;;  %v6639_v61 = vld [vmem:[%s6739_s27 + $0x94] sm:$0xf] }
 0x13e   : > { %6071 = vmatmul.mubr.msk.bf16.gmra.mrb[20].mxu1 %vm685_vm3, %v6588_v51  ;;  %6228 = vmatprep.mubr.msk.bf16.mxu0 %vm685_vm3, %v5602_v10  ;;  %v2304_v10 = vrot.slane %v2302_v18, 5  ;;  %v2332_v51 = vshll.u32 %v6639_v61, 16  ;;  %v2336_v28 = vshrl.u32 %v6639_v61, 16  ;;  %v2316_v0 = vrot.slane %v2315_v13, 4 }
 0x13f   : > { %6074 = vmatprep.mubr.msk.bf16.mxu1 %vm685_vm3, %v6589_v21  ;;  %v2347_v21 = vshrl.u32 %v5309_v35, 16  ;;  %v6642_v35 = vld [vmem:[%s6739_s27 + $0x98] sm:$0x1]  ;;  %v2371_v61 = vshrl.u32 %v5312_v39, 16  ;;  %v5318_v39 = vld [vmem:[%s6739_s27 + $0xc0] sm:$0xf] }
 0x140   : > { %v2305_v15 = vor.u32 %v2304_v10, %v2301_v36  ;;  %v8324_v26 = vrot.slane %v2332_v51, 5  ;;  %v2320_v36 = vrot.slane %v2318_v30, 5  ;;  %v2329_v10 = vor.u32 %v2328_v14, %v2325_v9  ;;  %v5315_v51 = vld [vmem:[%s6739_s27 + $0xb4] sm:$0xf] }
 0x141   : > { %v2349_v18 = vrot.slane %v2347_v21, 4  ;;  %v2384_v21 = vshrl.u32 %v6644_v27, 16  ;;  %v2395_v20 = vshrl.u32 %v5315_v51, 16  ;;  %v2398_v42 = vshll.u32 %v5315_v51, 16 }
 0x142   : > { %v2306_v52 = vrot.slane %v2305_v15, 4  ;;  %v2321_v46 = vsel %vm6765_vm4, %v2316_v0, %v2320_v36  ;;  %v2330_v15 = vrot.slane %v2329_v10, 4  ;;  %v2368_v30 = vrot.slane %v2366_v7, 5 }
 0x143   : > { %v2353_v23 = vor.u32 %v2352_v11, %v2349_v18  ;;  %v2373_v9 = vrot.slane %v2371_v61, 4  ;;  %v2386_v11 = vrot.slane %v2384_v21, 4  ;;  %v6648_v61 = vld [vmem:[%s6739_s27 + $0xbc] sm:$0x1] }
 0x144   : > { %v2311_v47 = vsel %vm6765_vm4, %v2306_v52, %v8304_v24  ;;  %v2335_v0 = vsel %vm6765_vm4, %v2330_v15, %v8324_v26  ;;  %v2414_v22 = vshll.u32 %v6648_v61, 16 }
 0x145   : > { %6229 = vmatmul.mubr.msk.bf16.gmra.mrb[8].mxu0 %vm685_vm3, %v5603_v40  ;;  %v2360_v40 = vshrl.u32 %v6640_v60, 16  ;;  %v2354_v17 = vrot.slane %v2353_v23, 4  ;;  %v5332_v24 = vcombine.low %v2311_v47, %v2321_v46 }
 0x146   : > { %6075 = vmatmul.mubr.msk.bf16.gmra.mrb[24].mxu1 %vm685_vm3, %v6590_v2  ;;  %6232 = vmatprep.mubr.msk.bf16.mxu0 %vm685_vm3, %v5604_v54  ;;  %v2338_v54 = vrot.slane %v2336_v28, 4 }
 0x147   : > { %6078 = vmatprep.mubr.msk.bf16.mxu1 %vm685_vm3, %v6591_v34  ;;  %v2362_v2 = vrot.slane %v2360_v40, 4  ;;  %v2342_v34 = vshll.u32 %v6642_v35, 16  ;;  %v2359_v10 = vsel %vm6765_vm4, %v2354_v17, %v8327_v6  ;;  %v2440_v17 = vrot.slane %v2438_v57, 5 }
 0x148   : > { %v2339_v49 = vor.u32 %v2338_v54, %v8324_v26  ;;  %v2376_v54 = vrot.slane %v2374_v45, 5  ;;  %v6646_v26 = vld [vmem:[%s6739_s27 + $0xb0] sm:$0x1] }
 0x149   : > { %v2363_v28 = vor.u32 %v2362_v2, %v8327_v6  ;;  %v2344_v60 = vrot.slane %v2342_v34, 5  ;;  %v2390_v35 = vshll.u32 %v6646_v26, 16  ;;  %v2419_v34 = vshrl.u32 %v5318_v39, 16 }
 0x14a   : > { %v2340_v13 = vrot.slane %v2339_v49, 4  ;;  %v2377_v38 = vor.u32 %v2376_v54, %v2373_v9  ;;  %v2422_v6 = vshll.u32 %v5318_v39, 16  ;;  %v6647_v49 = vld [vmem:[%s6739_s27 + $0xc4] sm:$0xf] }
 0x14b   : > { %v2364_v14 = vrot.slane %v2363_v28, 4  ;;  %v2428_v23 = vshll.u32 %v6647_v49, 16  ;;  %v2432_v25 = vshrl.u32 %v6647_v49, 16  ;;  %v2392_v45 = vrot.slane %v2390_v35, 5 }
 0x14c   : > { %v2345_v36 = vsel %vm6765_vm4, %v2340_v13, %v2344_v60  ;;  %v2378_v51 = vrot.slane %v2377_v38, 4  ;;  %v2416_v60 = vrot.slane %v2414_v22, 5 }
 0x14d   : > { %6233 = vmatmul.mubr.msk.bf16.gmra.mrb[12].mxu0 %vm685_vm3, %v5605_v53  ;;  %v2380_v53 = vshll.u32 %v6644_v27, 16  ;;  %v2369_v59 = vsel %vm6765_vm4, %v2364_v14, %v2368_v30  ;;  %v5333_v44 = vcombine.low %v2335_v0, %v2345_v36  ;;  %v2421_v27 = vrot.slane %v2419_v34, 4 }
 0x14e   : > { %6079 = vmatmul.mubr.msk.bf16.gmra.mrb[28].mxu1 %vm685_vm3, %v6592_v19  ;;  %6236 = vmatprep.mubr.msk.bf16.mxu0 %vm685_vm3, %v5606_v33  ;;  %v6645_v33 = vld [vmem:[%s6739_s27 + $0xb8] sm:$0xf]  ;;  %v2397_v19 = vrot.slane %v2395_v20, 4  ;;  %v2430_v21 = vrot.slane %v2428_v23, 5  ;;  %v2434_v47 = vrot.slane %v2432_v25, 4 }
 0x14f   : > { %6100 = vmatprep.mubr.msk.bf16.mxu1 %vm685_vm3, %v5330_v41  ;;  %v2404_v12 = vshll.u32 %v6645_v33, 16  ;;  %v2408_v40 = vshrl.u32 %v6645_v33, 16  ;;  %v2382_v18 = vrot.slane %v2380_v53, 5  ;;  %v2400_v41 = vrot.slane %v2398_v42, 5 }
 0x150   : > { %v2424_v53 = vrot.slane %v2422_v6, 5 }
 0x151   : > { %v2406_v52 = vrot.slane %v2404_v12, 5  ;;  %v2410_v2 = vrot.slane %v2408_v40, 4  ;;  %v2383_v20 = vsel %vm6765_vm4, %v2378_v51, %v2382_v18  ;;  %v2435_v12 = vor.u32 %v2434_v47, %v2430_v21 }
 0x152   : > { %v2425_v33 = vor.u32 %v2424_v53, %v2421_v27 }
 0x153   : > { %v2411_v7 = vor.u32 %v2410_v2, %v2406_v52  ;;  %v2436_v13 = vrot.slane %v2435_v12, 4  ;;  %v8426_v2 = vld [vmem:[%s8497_s2] ss:$0 sm:$0xff] }
 0x154   : > { %v2426_v40 = vrot.slane %v2425_v33, 4 }
 0x155   : > { %6237 = vmatmul.mubr.msk.bf16.gmra.mrb[16].mxu0 %vm685_vm3, %v5607_v37  ;;  %v2387_v37 = vor.u32 %v2386_v11, %v2382_v18  ;;  %v2412_v15 = vrot.slane %v2411_v7, 4  ;;  %v2441_v9 = vsel %vm6765_vm4, %v2436_v13, %v2440_v17 }
 0x156   : > { %6101 = vmatmul.mubr.msk.bf16.vlgmr.msra.gmra.mrb[16].mxu1 %vm685_vm3, %v8133_v1  ;;  %6240 = vmatprep.mubr.msk.bf16.mxu0 %vm685_vm3, %v5608_v3  ;;  %v2401_v1 = vor.u32 %v2400_v41, %v2397_v19  ;;  %v5334_v3 = vcombine.low %v2359_v10, %v2369_v59  ;;  %v2431_v30 = vsel %vm6765_vm4, %v2426_v40, %v2430_v21 }
 0x157   : > { %6104 = vmatprep.mubr.msk.bf16.mxu1 %vm685_vm3, %v5332_v24  ;;  %v2388_v28 = vrot.slane %v2387_v37, 4  ;;  %v2417_v48 = vsel %vm6765_vm4, %v2412_v15, %v2416_v60  ;;  %v5337_v14 = vcombine.low %v2431_v30, %v2441_v9 }
 0x158   : > { %v2402_v46 = vrot.slane %v2401_v1, 4 }
 0x159   : > { %v2393_v42 = vsel %vm6765_vm4, %v2388_v28, %v2392_v45 }
 0x15a   : > { %v5335_v62 = vcombine.low %v2383_v20, %v2393_v42 }
 0x15d   : > { %6241 = vmatmul.mubr.msk.bf16.gmra.mrb[20].mxu0 %vm685_vm3, %v5609_v8  ;;  %v2407_v8 = vsel %vm6765_vm4, %v2402_v46, %v2406_v52 }
 0x15e   : > { %6105 = vmatmul.mubr.msk.bf16.gmra.mrb[20].mxu1 %vm685_vm3, %v5333_v44  ;;  %6244 = vmatprep.mubr.msk.bf16.mxu0 %vm685_vm3, %v5610_v56  ;;  %v5336_v56 = vcombine.low %v2407_v8, %v2417_v48 }
 0x15f   : > { %6108 = vmatprep.mubr.msk.bf16.mxu1 %vm685_vm3, %v5334_v3 }
 0x165   : > { %6245 = vmatmul.mubr.msk.bf16.gmra.mrb[24].mxu0 %vm685_vm3, %v5611_v43 }
 0x166   : > { %6109 = vmatmul.mubr.msk.bf16.gmra.mrb[24].mxu1 %vm685_vm3, %v5335_v62  ;;  %6248 = vmatprep.mubr.msk.bf16.mxu0 %vm685_vm3, %v5612_v50 }
 0x167   : > { %6112 = vmatprep.mubr.msk.bf16.mxu1 %vm685_vm3, %v5336_v56 }
 0x16d   : > { %6249 = vmatmul.mubr.msk.bf16.gmra.mrb[28].mxu0 %vm685_vm3, %v5613_v29 }
 0x16e   : > { %6113 = vmatmul.mubr.msk.bf16.gmra.mrb[28].mxu1 %vm685_vm3, %v5337_v14 }
 0x1e9   : > { %v6052_v63 = vpop.f32.mrb[0].mxu1 }
 0x1ea   : > { %v1851_v4 = vpop.f32.mrb[1].mxu1 }
 0x1eb   : > { %v6053_v43 = vpop.f32.mrb[2].mxu1 }
 0x1ec   : > { %v1854_v16 = vpop.f32.mrb[3].mxu1 }
 0x1f1   : > { %v6056_v58 = vpop.f32.mrb[4].mxu1 }
 0x1f2   : > { %v1867_v50 = vpop.f32.mrb[5].mxu1 }
 0x1f3   : > { %v6057_v54 = vpop.f32.mrb[6].mxu1 }
 0x1f4   : > { %v1870_v18 = vpop.f32.mrb[7].mxu1 }
 0x1f9   : > { %v6060_v11 = vpop.f32.mrb[8].mxu1 }
 0x1fa   : > { %v1883_v24 = vpop.f32.mrb[9].mxu1 }
 0x1fb   : > { %v6061_v32 = vpop.f32.mrb[10].mxu1 }
 0x1fc   : > { %v1886_v19 = vpop.f32.mrb[11].mxu1 }
 0x201   : > { %v8415_v41 = vpop.f32.mrb[12].mxu1 }
 0x202   : > { %v8417_v5 = vpop.f32.mrb[13].mxu1 }
 0x203   : > { %v8419_v55 = vpop.f32.mrb[14].mxu1 }
 0x204   : > { %v8421_v29 = vpop.f32.mrb[15].mxu1 }
 0x208   : > { %v6222_v52 = vpop.f32.mrb[0].mxu0 }
 0x209   : > { %v6254_v39 = vadd.f32 %v6222_v52, %v6052_v63  ;;  %v4605_v0 = vpop.f32.mrb[1].mxu0 }
 0x20a   : > { %v6255_v36 = vadd.f32 %v4605_v0, %v1851_v4  ;;  %v6223_v10 = vpop.f32.mrb[2].mxu0 }
 0x20b   : > { %v4773_v59 = vadd.f32 %v6254_v39, %v8426_v2  ;;  %v6256_v38 = vadd.f32 %v6223_v10, %v6053_v43  ;;  %v4608_v37 = vpop.f32.mrb[3].mxu0 }
 0x20c   : > { %v4771_v26 = vadd.f32 %v6255_v36, %v8426_v2  ;;  %v6257_v35 = vadd.f32 %v4608_v37, %v1854_v16 }
 0x20d   : > { %v4774_v34 = vadd.f32 %v6256_v38, %v8426_v2  ;;  %v4805_v49 = vmax.f32 %v4773_v59, 0.0 }
 0x20e   : > { %v4772_v6 = vadd.f32 %v6257_v35, %v8426_v2  ;;  %v4803_v25 = vmax.f32 %v4771_v26, 0.0 }
 0x20f   : > { %v4806_v23 = vmax.f32 %v4774_v34, 0.0 }
 0x210   : > { %v4804_v1 = vmax.f32 %v4772_v6, 0.0  ;;  %v6226_v7 = vpop.f32.mrb[4].mxu0 }
 0x211   : > { %v5706_v61 = vpack.c.bf16 %v4806_v23, %v4805_v49  ;;  %v6258_v22 = vadd.f32 %v6226_v7, %v6056_v58  ;;  %v4621_v44 = vpop.f32.mrb[5].mxu0 }
 0x212   : > { %v5701_v3 = vpack.c.bf16 %v4804_v1, %v4803_v25  ;;  %v6259_v51 = vadd.f32 %v4621_v44, %v1867_v50  ;;  %v6227_v28 = vpop.f32.mrb[6].mxu0 }
 0x213   : > { %5778 = vst [vmem:[%s8436_s24 + $0x8] sm:$0xff] %v5706_v61   ;;  %v4777_v45 = vadd.f32 %v6258_v22, %v8426_v2  ;;  %v6260_v27 = vadd.f32 %v6227_v28, %v6057_v54  ;;  %v4624_v53 = vpop.f32.mrb[7].mxu0 }
 0x214   : > { %5702 = vst [vmem:[%s8436_s24] sm:$0xff] %v5701_v3   ;;  %v4775_v21 = vadd.f32 %v6259_v51, %v8426_v2  ;;  %v6261_v47 = vadd.f32 %v4624_v53, %v1870_v18 }
 0x215   : > { %v4778_v46 = vadd.f32 %v6260_v27, %v8426_v2  ;;  %v4809_v60 = vmax.f32 %v4777_v45, 0.0 }
 0x216   : > { %v4776_v15 = vadd.f32 %v6261_v47, %v8426_v2  ;;  %v4807_v42 = vmax.f32 %v4775_v21, 0.0 }
 0x217   : > { %v4810_v20 = vmax.f32 %v4778_v46, 0.0 }
 0x218   : > { %v4808_v33 = vmax.f32 %v4776_v15, 0.0  ;;  %v6230_v12 = vpop.f32.mrb[8].mxu0 }
 0x219   : > { %v5716_v31 = vpack.c.bf16 %v4810_v20, %v4809_v60  ;;  %v6262_v57 = vadd.f32 %v6230_v12, %v6060_v11  ;;  %v4637_v8 = vpop.f32.mrb[9].mxu0 }
 0x21a   : > { %v5711_v48 = vpack.c.bf16 %v4808_v33, %v4807_v42  ;;  %v6263_v62 = vadd.f32 %v4637_v8, %v1883_v24  ;;  %v6231_v56 = vpop.f32.mrb[10].mxu0 }
 0x21b   : > { %5780 = vst [vmem:[%s8436_s24 + $0x18] sm:$0xff] %v5716_v31   ;;  %v4781_v40 = vadd.f32 %v6262_v57, %v8426_v2  ;;  %v6264_v13 = vadd.f32 %v6231_v56, %v6061_v32  ;;  %v4640_v17 = vpop.f32.mrb[11].mxu0 }
 0x21c   : > { %5779 = vst [vmem:[%s8436_s24 + $0x10] sm:$0xff] %v5711_v48   ;;  %v4779_v30 = vadd.f32 %v6263_v62, %v8426_v2  ;;  %v6265_v9 = vadd.f32 %v4640_v17, %v1886_v19 }
 0x21d   : > { %v4782_v14 = vadd.f32 %v6264_v13, %v8426_v2  ;;  %v4813_v4 = vmax.f32 %v4781_v40, 0.0 }
 0x21e   : > { %v4780_v63 = vadd.f32 %v6265_v9, %v8426_v2  ;;  %v4811_v16 = vmax.f32 %v4779_v30, 0.0 }
 0x21f   : > { %v4814_v43 = vmax.f32 %v4782_v14, 0.0 }
 0x220   : > { %v4812_v58 = vmax.f32 %v4780_v63, 0.0  ;;  %v6234_v50 = vpop.f32.mrb[12].mxu0 }
 0x221   : > { %v5726_v54 = vpack.c.bf16 %v4814_v43, %v4813_v4  ;;  %v6266_v18 = vadd.f32 %v6234_v50, %v8415_v41  ;;  %v4653_v11 = vpop.f32.mrb[13].mxu0 }
 0x222   : > { %v5721_v24 = vpack.c.bf16 %v4812_v58, %v4811_v16  ;;  %v6267_v32 = vadd.f32 %v4653_v11, %v8417_v5  ;;  %v6235_v52 = vpop.f32.mrb[14].mxu0 }
 0x223   : > { %5782 = vst [vmem:[%s8436_s24 + $0x28] sm:$0xff] %v5726_v54   ;;  %v4785_v19 = vadd.f32 %v6266_v18, %v8426_v2  ;;  %v6268_v39 = vadd.f32 %v6235_v52, %v8419_v55  ;;  %v4656_v0 = vpop.f32.mrb[15].mxu0 }
 0x224   : > { %5781 = vst [vmem:[%s8436_s24 + $0x20] sm:$0xff] %v5721_v24   ;;  %v4783_v36 = vadd.f32 %v6267_v32, %v8426_v2  ;;  %v6269_v10 = vadd.f32 %v4656_v0, %v8421_v29 }
 0x225   : > { %v4786_v59 = vadd.f32 %v6268_v39, %v8426_v2  ;;  %v4817_v38 = vmax.f32 %v4785_v19, 0.0 }
 0x226   : > { %v4784_v41 = vadd.f32 %v6269_v10, %v8426_v2  ;;  %v4815_v37 = vmax.f32 %v4783_v36, 0.0 }
 0x227   : > { %v4818_v5 = vmax.f32 %v4786_v59, 0.0 }
 0x228   : > { %v4816_v26 = vmax.f32 %v4784_v41, 0.0  ;;  %v6238_v35 = vpop.f32.mrb[16].mxu0 }
 0x229   : > { %v5736_v34 = vpack.c.bf16 %v4818_v5, %v4817_v38  ;;  %v6102_v6 = vpop.f32.mrb[16].mxu1  ;;  %v4669_v55 = vpop.f32.mrb[17].mxu0 }
 0x22a   : > { %v5731_v49 = vpack.c.bf16 %v4816_v26, %v4815_v37  ;;  %v6270_v23 = vadd.f32 %v6238_v35, %v6102_v6  ;;  %v2641_v25 = vpop.f32.mrb[17].mxu1  ;;  %v6239_v1 = vpop.f32.mrb[18].mxu0 }
 0x22b   : > { %5784 = vst [vmem:[%s8436_s24 + $0x38] sm:$0xff] %v5736_v34   ;;  %v6271_v7 = vadd.f32 %v4669_v55, %v2641_v25  ;;  %v6103_v29 = vpop.f32.mrb[18].mxu1  ;;  %v4672_v61 = vpop.f32.mrb[19].mxu0 }
 0x22c   : > { %5783 = vst [vmem:[%s8436_s24 + $0x30] sm:$0xff] %v5731_v49   ;;  %v4789_v22 = vadd.f32 %v6270_v23, %v8426_v2  ;;  %v6272_v44 = vadd.f32 %v6239_v1, %v6103_v29  ;;  %v2644_v3 = vpop.f32.mrb[19].mxu1 }
 0x22d   : > { %v4787_v51 = vadd.f32 %v6271_v7, %v8426_v2  ;;  %v6273_v28 = vadd.f32 %v4672_v61, %v2644_v3 }
 0x22e   : > { %v4790_v45 = vadd.f32 %v6272_v44, %v8426_v2  ;;  %v4821_v53 = vmax.f32 %v4789_v22, 0.0 }
 0x22f   : > { %v4788_v27 = vadd.f32 %v6273_v28, %v8426_v2  ;;  %v4819_v46 = vmax.f32 %v4787_v51, 0.0 }
 0x230   : > { %v4822_v21 = vmax.f32 %v4790_v45, 0.0  ;;  %v6242_v47 = vpop.f32.mrb[20].mxu0 }
 0x231   : > { %v4820_v15 = vmax.f32 %v4788_v27, 0.0  ;;  %v6106_v60 = vpop.f32.mrb[20].mxu1  ;;  %v4685_v20 = vpop.f32.mrb[21].mxu0 }
 0x232   : > { %v5746_v42 = vpack.c.bf16 %v4822_v21, %v4821_v53  ;;  %v6274_v33 = vadd.f32 %v6242_v47, %v6106_v60  ;;  %v2657_v12 = vpop.f32.mrb[21].mxu1  ;;  %v6243_v31 = vpop.f32.mrb[22].mxu0 }
 0x233   : > { %v5741_v57 = vpack.c.bf16 %v4820_v15, %v4819_v46  ;;  %v6275_v8 = vadd.f32 %v4685_v20, %v2657_v12  ;;  %v6107_v48 = vpop.f32.mrb[22].mxu1  ;;  %v4688_v62 = vpop.f32.mrb[23].mxu0 }
 0x234   : > { %5786 = vst [vmem:[%s8436_s24 + $0x48] sm:$0xff] %v5746_v42   ;;  %v4793_v56 = vadd.f32 %v6274_v33, %v8426_v2  ;;  %v6276_v40 = vadd.f32 %v6243_v31, %v6107_v48  ;;  %v2660_v13 = vpop.f32.mrb[23].mxu1 }
 0x235   : > { %5785 = vst [vmem:[%s8436_s24 + $0x40] sm:$0xff] %v5741_v57   ;;  %v4791_v17 = vadd.f32 %v6275_v8, %v8426_v2  ;;  %v6277_v30 = vadd.f32 %v4688_v62, %v2660_v13 }
 0x236   : > { %v4794_v9 = vadd.f32 %v6276_v40, %v8426_v2  ;;  %v4825_v63 = vmax.f32 %v4793_v56, 0.0 }
 0x237   : > { %v4792_v14 = vadd.f32 %v6277_v30, %v8426_v2  ;;  %v4823_v16 = vmax.f32 %v4791_v17, 0.0 }
 0x238   : > { %v4826_v4 = vmax.f32 %v4794_v9, 0.0  ;;  %v6246_v43 = vpop.f32.mrb[24].mxu0 }
 0x239   : > { %v4824_v58 = vmax.f32 %v4792_v14, 0.0  ;;  %v6110_v50 = vpop.f32.mrb[24].mxu1  ;;  %v4701_v54 = vpop.f32.mrb[25].mxu0 }
 0x23a   : > { %v5756_v18 = vpack.c.bf16 %v4826_v4, %v4825_v63  ;;  %v6278_v11 = vadd.f32 %v6246_v43, %v6110_v50  ;;  %v2673_v24 = vpop.f32.mrb[25].mxu1  ;;  %v6247_v32 = vpop.f32.mrb[26].mxu0 }
 0x23b   : > { %v5751_v52 = vpack.c.bf16 %v4824_v58, %v4823_v16  ;;  %v6279_v19 = vadd.f32 %v4701_v54, %v2673_v24  ;;  %v6111_v39 = vpop.f32.mrb[26].mxu1  ;;  %v4704_v0 = vpop.f32.mrb[27].mxu0 }
 0x23c   : > { %5788 = vst [vmem:[%s8436_s24 + $0x58] sm:$0xff] %v5756_v18   ;;  %v4797_v36 = vadd.f32 %v6278_v11, %v8426_v2  ;;  %v6280_v10 = vadd.f32 %v6247_v32, %v6111_v39  ;;  %v2676_v59 = vpop.f32.mrb[27].mxu1 }
 0x23d   : > { %5787 = vst [vmem:[%s8436_s24 + $0x50] sm:$0xff] %v5751_v52   ;;  %v4795_v41 = vadd.f32 %v6279_v19, %v8426_v2  ;;  %v6281_v38 = vadd.f32 %v4704_v0, %v2676_v59 }
 0x23e   : > { %v4798_v5 = vadd.f32 %v6280_v10, %v8426_v2  ;;  %v4829_v26 = vmax.f32 %v4797_v36, 0.0 }
 0x23f   : > { %v4796_v37 = vadd.f32 %v6281_v38, %v8426_v2  ;;  %v4827_v6 = vmax.f32 %v4795_v41, 0.0 }
 0x240   : > { %v4830_v35 = vmax.f32 %v4798_v5, 0.0  ;;  %v6250_v34 = vpop.f32.mrb[28].mxu0 }
 0x241   : > { %v4828_v55 = vmax.f32 %v4796_v37, 0.0  ;;  %v6114_v49 = vpop.f32.mrb[28].mxu1  ;;  %v4717_v23 = vpop.f32.mrb[29].mxu0 }
 0x242   : > { %v5766_v25 = vpack.c.bf16 %v4830_v35, %v4829_v26  ;;  %v6282_v1 = vadd.f32 %v6250_v34, %v6114_v49  ;;  %v2689_v7 = vpop.f32.mrb[29].mxu1  ;;  %v6251_v29 = vpop.f32.mrb[30].mxu0 }
 0x243   : > { %v5761_v61 = vpack.c.bf16 %v4828_v55, %v4827_v6  ;;  %v6283_v22 = vadd.f32 %v4717_v23, %v2689_v7  ;;  %v6115_v44 = vpop.f32.mrb[30].mxu1  ;;  %v4720_v3 = vpop.f32.mrb[31].mxu0 }
 0x244   : > { %5790 = vst [vmem:[%s8436_s24 + $0x68] sm:$0xff] %v5766_v25   ;;  %v4801_v51 = vadd.f32 %v6282_v1, %v8426_v2  ;;  %v6284_v28 = vadd.f32 %v6251_v29, %v6115_v44  ;;  %v2692_v45 = vpop.f32.mrb[31].mxu1 }
 0x245   : > { %5789 = vst [vmem:[%s8436_s24 + $0x60] sm:$0xff] %v5761_v61   ;;  %v4799_v27 = vadd.f32 %v6283_v22, %v8426_v2  ;;  %v6285_v53 = vadd.f32 %v4720_v3, %v2692_v45 }
 0x246   : > { %v4802_v21 = vadd.f32 %v6284_v28, %v8426_v2  ;;  %v4833_v46 = vmax.f32 %v4801_v51, 0.0 }
 0x247   : > { %v4800_v47 = vadd.f32 %v6285_v53, %v8426_v2  ;;  %v4831_v60 = vmax.f32 %v4799_v27, 0.0 }
 0x248   : > { %v4834_v15 = vmax.f32 %v4802_v21, 0.0 }
 0x249   : > { %v4832_v20 = vmax.f32 %v4800_v47, 0.0 }
 0x24a   : > { %v5776_v42 = vpack.c.bf16 %v4834_v15, %v4833_v46 }
 0x24b   : > { %v5771_v33 = vpack.c.bf16 %v4832_v20, %v4831_v60 }
 0x24c   : > { %5792 = vst [vmem:[%s8436_s24 + $0x78] sm:$0xff] %v5776_v42  }
 0x24d   : > { %5791 = vst [vmem:[%s8436_s24 + $0x70] sm:$0xff] %v5771_v33  }
 0x24e PF: > { %s13_s14 = sadd.s32 1, %s6672_s14   ;;  %s8566_s12 = smov %s6668_s13 }
 0x24f   : > { %p10_p5 = scmp.ge.s32.totalorder %s13_s14, 4   ;;  %s8567_s13 = smov %s8569_s15 }
 0x251   :  { %12 = sbr.rel (!%p10_p5) target bundleno = 2 (0x2), region = 73 }

</bundles_post_ra>
